<compile_context>
chip_gen: v7x
topology: tpu7x:2x2x1
jax: 0.10.0
libtpu: 0.0.40
codegen_flags: <defaults>
</compile_context>

<pallas_src>
import numpy as np
import jax
import jax.numpy as jnp
from jax.experimental import pallas as pl
from jax.experimental.pallas import tpu as pltpu


def _compute_padding(size, k, s):
    # identical to CircularConv2d._compute_padding
    if size % s == 0:
        pad = max(k - s, 0)
    else:
        pad = max(k - size % s, 0)
    pad_top = pad // 2
    pad_bottom = pad - pad_top
    return (pad_top, pad_bottom)


def _round_up(x, m):
    return (x + m - 1) // m * m


def _padded_vmem_bytes(shape, dtype):
    """Approximate VMEM footprint of a buffer after (sublane, 128) tiling."""
    itemsize = np.dtype(dtype).itemsize
    if len(shape) < 2:
        return _round_up(int(np.prod(shape, initial=1)) * itemsize, 512)
    sub_mult = 8 * max(1, 4 // itemsize)          # 8 for f32, 16 for bf16
    lane = _round_up(shape[-1], 128)
    subl = _round_up(shape[-2], sub_mult)
    outer = 1
    for d in shape[:-2]:
        outer *= int(d)
    return outer * subl * lane * itemsize


def _pick_row_tile(h_out, w_out, n_batch, target_m=512):
    """Pick TH dividing H_out.  Tiled (TH < H_out) bands must give a 128-lane
    aligned output block (lane-dense stores + legal BlockSpec); prefer the
    largest M = TH*W_out <= target_m.  Only when the batch axis cannot feed
    both v7x TensorCores (N == 1) do we prefer >= 2 bands."""
    candidates = []
    for th in range(1, h_out + 1):
        if h_out % th:
            continue
        m = th * w_out
        if th < h_out and m % 128:
            continue            # tiled output blocks must be lane-aligned
        candidates.append(th)
    fitting = [th for th in candidates if th * w_out <= target_m]
    th = max(fitting) if fitting else min(candidates)
    if n_batch == 1 and th == h_out and h_out > 1:
        smaller = [c for c in (fitting if fitting else candidates) if c < h_out]
        if smaller:
            th = max(smaller)
    return th


def _make_conv_kernel(KH, KW, SH, SW, TH, W_out, K):
    """One grid step = one batch element x one band of TH output rows.

    x_ref: (Hp, Wp, Cin)            circularly padded input (compute dtype)
    w_ref: (COUT_P, KH*KW*Cin)      folded weight matrix (compute dtype)
    b_ref: (COUT_P, 1)              bias (f32)
    o_ref: (COUT_P, TH*W_out)       output band: channels x flattened pixels (f32)
    """

    def kernel(x_ref, w_ref, b_ref, o_ref):
        t = pl.program_id(1)
        row0 = pl.multiple_of(t * (TH * SH), TH * SH)   # first padded input row

        # On-chip im2col: KH*KW direct slices of the resident padded image,
        # concatenated once along the (folded) contraction dim.
        taps = []
        for kh in range(KH):
            if SH == 1:
                rsl = pl.ds(row0 + kh, TH)
            else:
                rsl = pl.ds(row0 + kh, TH, SH)
            for kw in range(KW):
                if SW == 1:
                    csl = pl.ds(kw, W_out)
                else:
                    csl = pl.ds(kw, W_out, SW)
                taps.append(x_ref[rsl, csl, :])          # (TH, W_out, Cin)
        slab = jnp.concatenate(taps, axis=-1)            # (TH, W_out, KH*KW*Cin)
        slab = slab.reshape(TH * W_out, K)               # cheap leading-dim merge

        # Single folded-K MXU matmul (f32 accumulation):
        #   (COUT_P, K) x (M, K)^T -> (COUT_P, M)
        res = jax.lax.dot_general(
            w_ref[...], slab,
            dimension_numbers=(((1,), (1,)), ((), ())),
            preferred_element_type=jnp.float32)

        # f32 bias add, lane-dense store (spatial dim on lanes).
        o_ref[...] = (res + b_ref[...]).astype(o_ref.dtype)

    return kernel


def circular_conv2d(x, weight, bias, kernel_size, stride,
                    compute_dtype=jnp.bfloat16, target_m=512):
    """x: (N, C_in, H, W) f32 NCHW; weight: (C_out, C_in, KH, KW); bias: (C_out,)."""
    KH, KW = kernel_size
    sh, sw = stride
    N, C_in, H, W = x.shape
    C_out = weight.shape[0]

    pad_h = _compute_padding(H, KH, sh)
    pad_w = _compute_padding(W, KW, sw)
    # PyTorch circular padding errors when pad > size; keep parity explicit.
    assert max(pad_h) <= H and max(pad_w) <= W, \
        "circular padding larger than the input is not supported (torch parity)"

    # --- glue: NCHW -> NHWC, circular pad ('wrap' == torch 'circular'), one cast.
    # TODO(synk): if the surrounding model stays NHWC end-to-end this transpose
    # (and the cast pass) disappears.
    x_nhwc = jnp.transpose(x, (0, 2, 3, 1))
    xp = jnp.pad(x_nhwc, ((0, 0), pad_h, pad_w, (0, 0)), mode="wrap")
    xp = xp.astype(compute_dtype)
    Hp = H + pad_h[0] + pad_h[1]
    Wp = W + pad_w[0] + pad_w[1]
    H_out = (Hp - KH) // sh + 1
    W_out = (Wp - KW) // sw + 1

    # --- weights: (Cout, Cin, KH, KW) -> (COUT_P, KH*KW*Cin); Cout padded only
    #     to a sublane multiple (8), since Cout now lives on sublanes of the
    #     output (no 128-wide channel padding / write amplification).
    K = KH * KW * C_in
    COUT_P = _round_up(max(C_out, 1), 8)
    w2 = jnp.transpose(weight, (0, 2, 3, 1)).reshape(C_out, K)     # (co, kh, kw, ci)
    w2 = jnp.pad(w2, ((0, COUT_P - C_out), (0, 0))).astype(compute_dtype)
    b2 = jnp.pad(bias, (0, COUT_P - C_out)).astype(jnp.float32).reshape(COUT_P, 1)

    TH = _pick_row_tile(H_out, W_out, N, target_m)
    n_bands = H_out // TH
    M_tile = TH * W_out

    kernel = _make_conv_kernel(KH, KW, sh, sw, TH, W_out, K)

    # --- explicit VMEM budget (double-buffered image + output band, weights,
    #     bias, slab + transients), clamped to what every TPU generation has.
    est = (2 * _padded_vmem_bytes((Hp, Wp, C_in), compute_dtype)
           + 2 * _padded_vmem_bytes((COUT_P, M_tile), jnp.float32)
           + _padded_vmem_bytes((COUT_P, K), compute_dtype)
           + _padded_vmem_bytes((COUT_P, 1), jnp.float32)
           + 3 * _padded_vmem_bytes((M_tile, K), compute_dtype)
           + (2 << 20))
    vmem_limit = int(min(max(32 << 20, 2 * est), 64 << 20))

    flops = 2 * N * H_out * W_out * K * C_out
    bytes_accessed = (xp.size * xp.dtype.itemsize
                      + w2.size * w2.dtype.itemsize
                      + b2.size * 4
                      + N * COUT_P * H_out * W_out * 4)

    out = pl.pallas_call(
        kernel,
        out_shape=jax.ShapeDtypeStruct((N, COUT_P, H_out * W_out), jnp.float32),
        grid_spec=pltpu.PrefetchScalarGridSpec(
            num_scalar_prefetch=0,
            grid=(N, n_bands),
            in_specs=[
                # Full padded image of one batch element; index_map is constant
                # over the band axis, so it is NOT re-DMA'd per band.
                pl.BlockSpec((pl.Squeezed(), Hp, Wp, C_in),
                             lambda n, t: (n, 0, 0, 0)),
                # Weights / bias: constant index_map -> fetched once, VMEM
                # resident for the whole grid.
                pl.BlockSpec((COUT_P, K), lambda n, t: (0, 0)),
                pl.BlockSpec((COUT_P, 1), lambda n, t: (0, 0)),
            ],
            out_specs=pl.BlockSpec((pl.Squeezed(), COUT_P, M_tile),
                                   lambda n, t: (n, 0, t)),
        ),
        compiler_params=pltpu.CompilerParams(
            dimension_semantics=("parallel", "parallel"),
            vmem_limit_bytes=vmem_limit),
        cost_estimate=pl.CostEstimate(
            flops=flops, transcendentals=0, bytes_accessed=bytes_accessed),
    )(xp, w2, b2)

    # --- glue: drop the (sublane-granular) channel padding; already NCHW, so a
    #     reshape is all that is left — no final transpose pass.
    out = out[:, :C_out, :].reshape(N, C_out, H_out, W_out)
    return out.astype(x.dtype)


def _reference(x, weight, bias, kernel_size, stride):
    """Pure-JAX f32 reference (circular pad + VALID conv)."""
    KH, KW = kernel_size
    sh, sw = stride
    H, W = x.shape[-2:]
    pad_h = _compute_padding(H, KH, sh)
    pad_w = _compute_padding(W, KW, sw)
    xp = jnp.pad(x, ((0, 0), (0, 0), pad_h, pad_w), mode="wrap")
    y = jax.lax.conv_general_dilated(
        xp, weight, window_strides=(sh, sw), padding="VALID",
        dimension_numbers=("NCHW", "OIHW", "NCHW"))
    return y + bias[None, :, None, None]


if __name__ == "__main__":
    # CircularConv2d(in_channels=4, out_channels=8, kernel_size=3, stride=1, padding=1)
    N, C_in, H, W = 2, 4, 16, 16
    C_out = 8
    kernel_size = (3, 3)
    stride = (1, 1)

    key = jax.random.PRNGKey(0)
    kx, kw_, kb = jax.random.split(key, 3)
    x = jax.random.normal(kx, (N, C_in, H, W), dtype=jnp.float32)

    # deterministic "PyTorch-like" uniform init for conv weight/bias
    fan_in = C_in * kernel_size[0] * kernel_size[1]
    bound = 1.0 / (fan_in ** 0.5)
    weight = jax.random.uniform(kw_, (C_out, C_in, kernel_size[0], kernel_size[1]),
                                dtype=jnp.float32, minval=-bound, maxval=bound)
    bias = jax.random.uniform(kb, (C_out,), dtype=jnp.float32,
                              minval=-bound, maxval=bound)

    ref = jax.block_until_ready(_reference(x, weight, bias, kernel_size, stride))

    # f32 compute path: matches the f32 reference tightly.
    out_f32 = jax.block_until_ready(
        circular_conv2d(x, weight, bias, kernel_size, stride,
                        compute_dtype=jnp.float32))
    assert out_f32.shape == ref.shape == (N, C_out, H, W), (out_f32.shape, ref.shape)
    assert jnp.allclose(out_f32, ref, rtol=1e-4, atol=1e-4), "f32 kernel mismatch"

    # Default bf16-MXU path (per perf guidance for v5e/v6e/v7x): bf16
    # inputs/weights, f32 accumulation -> tolerance reflects bf16 input rounding.
    out_bf16 = jax.block_until_ready(
        circular_conv2d(x, weight, bias, kernel_size, stride))
    assert out_bf16.shape == ref.shape
    assert jnp.allclose(out_bf16, ref, rtol=2e-2, atol=2e-2), "bf16 kernel mismatch"

    print("KERNEL_OK")
</pallas_src>

<mosaic_0001>
module attributes {stable_mosaic.version = 11 : i64} {
  func.func @kernel(%arg0: i32, %arg1: i32, %arg2: memref<1x18x18x4xf32, #tpu.memory_space<vmem>>, %arg3: memref<8x36xf32, #tpu.memory_space<vmem>>, %arg4: memref<8x1xf32, #tpu.memory_space<vmem>>, %arg5: memref<1x8x256xf32, #tpu.memory_space<vmem>>) attributes {dimension_semantics = [#tpu.dimension_semantics<parallel>, #tpu.dimension_semantics<parallel>], iteration_bounds = array<i64: 2, 1>, scalar_prefetch = 0 : i64, scratch_operands = 0 : i64, tpu.core_type = #tpu.core_type<tc>, window_params = [{transform_indices = @transform_0, window_bounds = array<i64: 1, 18, 18, 4>}, {pipeline_mode = #tpu.pipeline_mode<synchronous>, transform_indices = @transform_1, window_bounds = array<i64: 8, 36>}, {pipeline_mode = #tpu.pipeline_mode<synchronous>, transform_indices = @transform_2, window_bounds = array<i64: 8, 1>}, {transform_indices = @transform_3, window_bounds = array<i64: 1, 8, 256>}]} {
    %c16_i32 = arith.constant 16 : i32
    %0 = arith.muli %arg1, %c16_i32 : i32
    %1 = tpu.assume_multiple %0, 16 : i32
    %c0_i32 = arith.constant 0 : i32
    %2 = arith.addi %1, %c0_i32 : i32
    %c0 = arith.constant 0 : index
    %3 = arith.index_cast %2 : i32 to index
    %c0_0 = arith.constant 0 : index
    %c0_1 = arith.constant 0 : index
    %4 = vector.load %arg2[%c0, %3, %c0_0, %c0_1] : memref<1x18x18x4xf32, #tpu.memory_space<vmem>>, vector<1x16x16x4xf32>
    %5 = vector.shape_cast %4 : vector<1x16x16x4xf32> to vector<16x16x4xf32>
    %c0_2 = arith.constant 0 : index
    %6 = arith.index_cast %2 : i32 to index
    %c1 = arith.constant 1 : index
    %c0_3 = arith.constant 0 : index
    %7 = vector.load %arg2[%c0_2, %6, %c1, %c0_3] : memref<1x18x18x4xf32, #tpu.memory_space<vmem>>, vector<1x16x16x4xf32>
    %8 = vector.shape_cast %7 : vector<1x16x16x4xf32> to vector<16x16x4xf32>
    %c0_4 = arith.constant 0 : index
    %9 = arith.index_cast %2 : i32 to index
    %c2 = arith.constant 2 : index
    %c0_5 = arith.constant 0 : index
    %10 = vector.load %arg2[%c0_4, %9, %c2, %c0_5] : memref<1x18x18x4xf32, #tpu.memory_space<vmem>>, vector<1x16x16x4xf32>
    %11 = vector.shape_cast %10 : vector<1x16x16x4xf32> to vector<16x16x4xf32>
    %c1_i32 = arith.constant 1 : i32
    %12 = arith.addi %1, %c1_i32 : i32
    %c0_6 = arith.constant 0 : index
    %13 = arith.index_cast %12 : i32 to index
    %c0_7 = arith.constant 0 : index
    %c0_8 = arith.constant 0 : index
    %14 = vector.load %arg2[%c0_6, %13, %c0_7, %c0_8] : memref<1x18x18x4xf32, #tpu.memory_space<vmem>>, vector<1x16x16x4xf32>
    %15 = vector.shape_cast %14 : vector<1x16x16x4xf32> to vector<16x16x4xf32>
    %c0_9 = arith.constant 0 : index
    %16 = arith.index_cast %12 : i32 to index
    %c1_10 = arith.constant 1 : index
    %c0_11 = arith.constant 0 : index
    %17 = vector.load %arg2[%c0_9, %16, %c1_10, %c0_11] : memref<1x18x18x4xf32, #tpu.memory_space<vmem>>, vector<1x16x16x4xf32>
    %18 = vector.shape_cast %17 : vector<1x16x16x4xf32> to vector<16x16x4xf32>
    %c0_12 = arith.constant 0 : index
    %19 = arith.index_cast %12 : i32 to index
    %c2_13 = arith.constant 2 : index
    %c0_14 = arith.constant 0 : index
    %20 = vector.load %arg2[%c0_12, %19, %c2_13, %c0_14] : memref<1x18x18x4xf32, #tpu.memory_space<vmem>>, vector<1x16x16x4xf32>
    %21 = vector.shape_cast %20 : vector<1x16x16x4xf32> to vector<16x16x4xf32>
    %c2_i32 = arith.constant 2 : i32
    %22 = arith.addi %1, %c2_i32 : i32
    %c0_15 = arith.constant 0 : index
    %23 = arith.index_cast %22 : i32 to index
    %c0_16 = arith.constant 0 : index
    %c0_17 = arith.constant 0 : index
    %24 = vector.load %arg2[%c0_15, %23, %c0_16, %c0_17] : memref<1x18x18x4xf32, #tpu.memory_space<vmem>>, vector<1x16x16x4xf32>
    %25 = vector.shape_cast %24 : vector<1x16x16x4xf32> to vector<16x16x4xf32>
    %c0_18 = arith.constant 0 : index
    %26 = arith.index_cast %22 : i32 to index
    %c1_19 = arith.constant 1 : index
    %c0_20 = arith.constant 0 : index
    %27 = vector.load %arg2[%c0_18, %26, %c1_19, %c0_20] : memref<1x18x18x4xf32, #tpu.memory_space<vmem>>, vector<1x16x16x4xf32>
    %28 = vector.shape_cast %27 : vector<1x16x16x4xf32> to vector<16x16x4xf32>
    %c0_21 = arith.constant 0 : index
    %29 = arith.index_cast %22 : i32 to index
    %c2_22 = arith.constant 2 : index
    %c0_23 = arith.constant 0 : index
    %30 = vector.load %arg2[%c0_21, %29, %c2_22, %c0_23] : memref<1x18x18x4xf32, #tpu.memory_space<vmem>>, vector<1x16x16x4xf32>
    %31 = vector.shape_cast %30 : vector<1x16x16x4xf32> to vector<16x16x4xf32>
    %32 = tpu.concatenate %5, %8, %11, %15, %18, %21, %25, %28, %31 in 2 : vector<16x16x4xf32>, vector<16x16x4xf32>, vector<16x16x4xf32>, vector<16x16x4xf32>, vector<16x16x4xf32>, vector<16x16x4xf32>, vector<16x16x4xf32>, vector<16x16x4xf32>, vector<16x16x4xf32> -> vector<16x16x36xf32>
    %33 = vector.shape_cast %32 : vector<16x16x36xf32> to vector<256x36xf32>
    %c0_24 = arith.constant 0 : index
    %c0_25 = arith.constant 0 : index
    %34 = vector.load %arg3[%c0_24, %c0_25] : memref<8x36xf32, #tpu.memory_space<vmem>>, vector<8x36xf32>
    %cst = arith.constant dense<0.000000e+00> : vector<8x256xf32>
    %35 = tpu.matmul %34, %33, %cst {dimension_numbers = #tpu.dot_dimension_numbers<[1], [1], [0], [0], [0, 0, 1, 0], [], []>} : vector<8x36xf32>, vector<256x36xf32>, vector<8x256xf32> -> vector<8x256xf32>
    %c0_26 = arith.constant 0 : index
    %c0_27 = arith.constant 0 : index
    %36 = vector.load %arg4[%c0_26, %c0_27] : memref<8x1xf32, #tpu.memory_space<vmem>>, vector<8x1xf32>
    %37 = vector.broadcast %36 : vector<8x1xf32> to vector<8x256xf32>
    %38 = arith.addf %35, %37 : vector<8x256xf32>
    %c0_28 = arith.constant 0 : index
    %c0_29 = arith.constant 0 : index
    %c0_30 = arith.constant 0 : index
    %39 = vector.load %arg5[%c0_28, %c0_29, %c0_30] : memref<1x8x256xf32, #tpu.memory_space<vmem>>, vector<1x8x256xf32>
    %40 = vector.shape_cast %39 : vector<1x8x256xf32> to vector<8x256xf32>
    %41 = vector.shape_cast %38 : vector<8x256xf32> to vector<1x8x256xf32>
    tpu.vector_store %arg5[%c0_28, %c0_29, %c0_30], %41 {strides = array<i32>} : memref<1x8x256xf32, #tpu.memory_space<vmem>>, vector<1x8x256xf32>,
    return
  }
  func.func @transform_0(%arg0: i32, %arg1: i32) -> (i32, i32, i32, i32) {
    %c0_i32 = arith.constant 0 : i32
    %c0_i32_0 = arith.constant 0 : i32
    %c0_i32_1 = arith.constant 0 : i32
    %c0_i32_2 = arith.constant 0 : i32
    return %arg0, %c0_i32, %c0_i32_0, %c0_i32_1 : i32, i32, i32, i32
  }
  func.func @transform_1(%arg0: i32, %arg1: i32) -> (i32, i32) {
    %c0_i32 = arith.constant 0 : i32
    %c0_i32_0 = arith.constant 0 : i32
    %c0_i32_1 = arith.constant 0 : i32
    return %c0_i32, %c0_i32_0 : i32, i32
  }
  func.func @transform_2(%arg0: i32, %arg1: i32) -> (i32, i32) {
    %c0_i32 = arith.constant 0 : i32
    %c0_i32_0 = arith.constant 0 : i32
    %c0_i32_1 = arith.constant 0 : i32
    return %c0_i32, %c0_i32_0 : i32, i32
  }
  func.func @transform_3(%arg0: i32, %arg1: i32) -> (i32, i32, i32) {
    %c0_i32 = arith.constant 0 : i32
    %c0_i32_0 = arith.constant 0 : i32
    return %arg0, %c0_i32, %arg1 : i32, i32, i32
  }
}

</mosaic_0001>

<bundles_post_ra>
// kernel: tpu_custom_call.1
= control target key start
LH: loop header
LB: loop body
LE: loop exit
PB: predicated region body
PF: predicated region fallthrough
CT: control target
= control target key end

     0   :  { %8 = vsyncpa [#allocation3], 0  ;;  %s4349_s0 = inlined_call_operand.vmem [shape: f32[2,18,18,4], index: 0, kind: input, shape index: {}]   ;;  %s4350_s1 = inlined_call_operand.vmem [shape: f32[8,36], index: 1, kind: input, shape index: {}]   ;;  %s4351_s2 = inlined_call_operand.vmem [shape: f32[8,1], index: 2, kind: input, shape index: {}]   ;;  %s4352_s3 = inlined_call_operand.hbm [shape: f32[2,8,256], index: 3, kind: output, shape index: {}]  }
   0x1   :  { %10 = vsyncpa [#allocation3 + $0x1], 0  ;;  %s3184_s12 = smov 0   ;;  %s3186_s13 = smov 0  }
   0x2   :  { %s3188_s14 = smov 0   ;;  %s3190_s15 = smov 0  }
   0x3   :  { %s3192_s16 = smov 0   ;;  %s3194_s17 = smov 0  }
   0x4 LB: > { %s2046_s18 = sadd.s32 4294967295, %s3152_s17   ;;  %s2047_s19 = sadd.s32 4294967294, %s3152_s17   ;;  %s3152_s17 = sphi %s3194_s17, %s16_s17   ;;  %s3148_s16 = sphi %s3192_s16, %s4381_s16   ;;  %s3144_s15 = sphi %s3190_s15, %s4380_s15   ;;  %s3140_s14 = sphi %s3188_s14, %s4379_s14   ;;  %s3136_s13 = sphi %s3186_s13, %s4378_s13   ;;  %s3132_s12 = sphi %s3184_s12, %s4377_s12  }
   0x5   : > { %s28_s20 = sadd.s32 1, %s3148_s16  ;;  %s105_s21 = sadd.s32 1, %s3140_s14 }
   0x6   : > { %p30_p0 = scmp.ge.s32.totalorder %s28_s20, 2  ;;  %p115_p1 = scmp.ne.s32.totalorder %s3140_s14, %s3136_s13 }
   0x7   : > { %p116_p2 = scmp.eq.s32.totalorder %s2046_s18, 1  ;;  %p121_p3 = scmp.ne.s32.totalorder %s3136_s13, %s3132_s12 }
   0x8   : > { %s4383_s20 = smov (%p30_p0, %s28_s20), 0  ;;  %p122_p5 = scmp.eq.s32.totalorder %s2047_s19, 1 }
   0x9   : > { %p3224_p4 = por %p116_p2, %p115_p1  ;;  %s100_s23 = ssub.s32 %s3148_s16, %s4383_s20 }
   0xa   : > { %p2050_p6 = scmp.ge.s32.totalorder %s3152_s17, 1  ;;  %p103_p7 = scmp.eq.s32.totalorder %s100_s23, 0 }
   0xb   : > { %p3231_p8 = por %p122_p5, %p121_p3  ;;  %p154_p9 = scmp.lt.s32.totalorder %s3152_s17, 3 }
   0xc   : > { %s3237_s25 = scalar_select %p103_p7, %s3140_s14, %s105_s21  }
   0xd   : > { %p155_p10 = pnand %p2050_p6, %p154_p9 }
   0xf   : > { %158 = sbr.rel (%p155_p10) target bundleno = 642 (0x282), region = 32 }
  0x16   : > { %p178_p11 = scmp.lt.s32.totalorder %s3144_s15, 1  ;;  %s3154_s4 = smov 4   ;;  %vm1505_vm0 = vcmask 31744   ;;  %vm1538_vm1 = vcmask 64512   ;;  %vm1571_vm2 = vcmask 97280   ;;  %vm1604_vm3 = vcmask 130048  }
  0x17   : > { %s3155_s5 = smov 8   ;;  %s3156_s6 = smov 12   ;;  %vm1637_vm4 = vcmask 162816   ;;  %vm1670_vm5 = vcmask 195584   ;;  %vm1703_vm6 = vcmask 228352   ;;  %vm1736_vm7 = vcmask 261120  }
  0x18   : > { %s179_s26 = scalar_select %p178_p11, %s3144_s15, 1  ;;  %vm1776_vm8 = vcmask 293888  }
  0x19   : > { %s3157_s7 = smov 16   ;;  %s3158_s8 = smov 20   ;;  %vm3940_vm9 = vmpackc.low %vm1776_vm8, %vm1776_vm8 }
  0x1a   : > { %s2366_s27 = smul.u32 432, %s179_s26  ;;  %s3159_s9 = smov 24  }
  0x1b   : > { %s3160_s10 = smov 28   ;;  %s3161_s11 = smov 32  }
  0x1c   : > { %s3244_s30 = scalar_lea.vmem %s4349_s0, %s2366_s27  ;;  %s175_s26 = sand.u32 1, %s3136_s13  }
  0x1d   : > { %v223_v0 = vld [vmem:[%s3244_s30 + $0x31] sm:$0xff]  ;;  %v224_v1 = vld [vmem:[%s3244_s30 + $0x39] sm:$0xff]  ;;  %v219_v2 = vld [vmem:[%s3244_s30 + $0x1] sm:$0xff]  ;;  %s2051_s27 = sshll.u32 %s175_s26, 4  ;;  %s2283_s28 = sshll.u32 %s3144_s15, 8 }
  0x1e   : > { %v3249_v3 = vpack.i.bf16 %v224_v1, %v223_v0  ;;  %v220_v4 = vld [vmem:[%s3244_s30 + $0x9] sm:$0xff]  ;;  %v226_v6 = vld [vmem:[%s3244_s30 + $0x51] sm:$0xff]  ;;  %v221_v8 = vld [vmem:[%s3244_s30 + $0x19] sm:$0xff]  ;;  %s177_s29 = scalar_lea.vmem [#allocation2], %s2051_s27 }
  0x1f   : > { %v225_v5 = vld [vmem:[%s3244_s30 + $0x49] sm:$0xff]  ;;  %v2431_v7 = vpack.i.bf16 %v220_v4, %v219_v2  ;;  %v222_v9 = vld [vmem:[%s3244_s30 + $0x21] sm:$0xff]  ;;  %v229_v12 = vld [vmem:[%s3244_s30 + $0x79] sm:$0xff] }
  0x20   : > { %2442 = vrot.lane.b32.xlu1 %v3249_v3, %s3154_s4  ;;  %v3258_v10 = vpack.i.bf16 %v226_v6, %v225_v5  ;;  %v3261_v11 = vpack.i.bf16 %v222_v9, %v221_v8  ;;  %v230_v13 = vld [vmem:[%s3244_s30 + $0x81] sm:$0xff]  ;;  %v228_v15 = vld [vmem:[%s3244_s30 + $0x69] sm:$0xff]  ;;  %v234_v19 = vld [vmem:[%s3244_s30 + $0xb1] sm:$0xff] }
  0x21   : > { %2432 = vrot.lane.b32.xlu0 %v2431_v7, %s3154_s4  ;;  %v227_v14 = vld [vmem:[%s3244_s30 + $0x61] sm:$0xff]  ;;  %v3269_v16 = vpack.i.bf16 %v230_v13, %v229_v12  ;;  %v233_v18 = vld [vmem:[%s3244_s30 + $0xa9] sm:$0xff]  ;;  %v231_v20 = vld [vmem:[%s3244_s30 + $0x91] sm:$0xff] }
  0x22   : > { %v3273_v17 = vpack.i.bf16 %v228_v15, %v227_v14  ;;  %v232_v21 = vld [vmem:[%s3244_s30 + $0x99] sm:$0xff]  ;;  %v2466_v22 = vpack.i.bf16 %v234_v19, %v233_v18  ;;  %v238_v25 = vld [vmem:[%s3244_s30 + $0xe1] sm:$0xff]  ;;  %v236_v27 = vld [vmem:[%s3244_s30 + $0xc9] sm:$0xff] }
  0x23   : > { %v2461_v23 = vpack.i.bf16 %v232_v21, %v231_v20  ;;  %v237_v24 = vld [vmem:[%s3244_s30 + $0xd9] sm:$0xff]  ;;  %v235_v26 = vld [vmem:[%s3244_s30 + $0xc1] sm:$0xff]  ;;  %v241_v30 = vld [vmem:[%s3244_s30 + $0x109] sm:$0xff] }
  0x24   : > { %2447 = vrot.lane.b32.xlu1 %v3258_v10, %s3154_s4  ;;  %v3288_v28 = vpack.i.bf16 %v238_v25, %v237_v24  ;;  %v2471_v29 = vpack.i.bf16 %v236_v27, %v235_v26  ;;  %v242_v31 = vld [vmem:[%s3244_s30 + $0x111] sm:$0xff]  ;;  %v240_v33 = vld [vmem:[%s3244_s30 + $0xf9] sm:$0xff]  ;;  %v246_v37 = vld [vmem:[%s3244_s30 + $0x141] sm:$0xff] }
  0x25   : > { %2437 = vrot.lane.b32.xlu0 %v3261_v11, %s3154_s4  ;;  %v239_v32 = vld [vmem:[%s3244_s30 + $0xf1] sm:$0xff]  ;;  %v3297_v34 = vpack.i.bf16 %v242_v31, %v241_v30  ;;  %v245_v36 = vld [vmem:[%s3244_s30 + $0x139] sm:$0xff]  ;;  %v243_v38 = vld [vmem:[%s3244_s30 + $0x121] sm:$0xff] }
  0x26   : > { %v3300_v35 = vpack.i.bf16 %v240_v33, %v239_v32  ;;  %v244_v39 = vld [vmem:[%s3244_s30 + $0x129] sm:$0xff]  ;;  %v3308_v40 = vpack.i.bf16 %v246_v37, %v245_v36  ;;  %v250_v43 = vld [vmem:[%s3244_s30 + $0x171] sm:$0xff]  ;;  %v248_v45 = vld [vmem:[%s3244_s30 + $0x159] sm:$0xff] }
  0x27   : > { %v3312_v41 = vpack.i.bf16 %v244_v39, %v243_v38  ;;  %v249_v42 = vld [vmem:[%s3244_s30 + $0x169] sm:$0xff]  ;;  %v247_v44 = vld [vmem:[%s3244_s30 + $0x151] sm:$0xff]  ;;  %v253_v48 = vld [vmem:[%s3244_s30 + $0x1a] sm:$0xff] }
  0x28   : > { %2457 = vrot.lane.b32.xlu1 %v3269_v16, %s3154_s4  ;;  %v2506_v46 = vpack.i.bf16 %v250_v43, %v249_v42  ;;  %v3322_v47 = vpack.i.bf16 %v248_v45, %v247_v44  ;;  %v254_v49 = vld [vmem:[%s3244_s30 + $0x22] sm:$0xff]  ;;  %v252_v51 = vld [vmem:[%s3244_s30 + $0xa] sm:$0xff]  ;;  %v258_v55 = vld [vmem:[%s3244_s30 + $0x52] sm:$0xff] }
  0x29   : > { %2452 = vrot.lane.b32.xlu0 %v3273_v17, %s3154_s4  ;;  %v251_v50 = vld [vmem:[%s3244_s30 + $0x2] sm:$0xff]  ;;  %v3329_v52 = vpack.i.bf16 %v254_v49, %v253_v48  ;;  %v257_v54 = vld [vmem:[%s3244_s30 + $0x4a] sm:$0xff]  ;;  %v255_v56 = vld [vmem:[%s3244_s30 + $0x32] sm:$0xff] }
  0x2a   : > { %v2511_v53 = vpack.i.bf16 %v252_v51, %v251_v50  ;;  %v256_v57 = vld [vmem:[%s3244_s30 + $0x3a] sm:$0xff]  ;;  %v3339_v58 = vpack.i.bf16 %v258_v55, %v257_v54  ;;  %v262_v61 = vld [vmem:[%s3244_s30 + $0x82] sm:$0xff]  ;;  %v260_v63 = vld [vmem:[%s3244_s30 + $0x6a] sm:$0xff] }
  0x2b   : > { %v3342_v59 = vpack.i.bf16 %v256_v57, %v255_v56  ;;  %v261_v60 = vld [vmem:[%s3244_s30 + $0x7a] sm:$0xff]  ;;  %v259_v62 = vld [vmem:[%s3244_s30 + $0x62] sm:$0xff]  ;;  %v265_v2 = vld [vmem:[%s3244_s30 + $0xaa] sm:$0xff] }
  0x2c   : > { %2467 = vrot.lane.b32.xlu1 %v2466_v22, %s3154_s4  ;;  %v3350_v0 = vpack.i.bf16 %v262_v61, %v261_v60  ;;  %v3354_v1 = vpack.i.bf16 %v260_v63, %v259_v62  ;;  %v266_v4 = vld [vmem:[%s3244_s30 + $0xb2] sm:$0xff]  ;;  %v264_v6 = vld [vmem:[%s3244_s30 + $0x9a] sm:$0xff]  ;;  %v270_v12 = vld [vmem:[%s3244_s30 + $0xe2] sm:$0xff] }
  0x2d   : > { %2462 = vrot.lane.b32.xlu0 %v2461_v23, %s3154_s4  ;;  %v263_v5 = vld [vmem:[%s3244_s30 + $0x92] sm:$0xff]  ;;  %v2546_v7 = vpack.i.bf16 %v266_v4, %v265_v2  ;;  %v269_v9 = vld [vmem:[%s3244_s30 + $0xda] sm:$0xff]  ;;  %v267_v13 = vld [vmem:[%s3244_s30 + $0xc2] sm:$0xff] }
  0x2e   : > { %v2541_v8 = vpack.i.bf16 %v264_v6, %v263_v5  ;;  %v268_v14 = vld [vmem:[%s3244_s30 + $0xca] sm:$0xff]  ;;  %v3369_v15 = vpack.i.bf16 %v270_v12, %v269_v9  ;;  %v274_v20 = vld [vmem:[%s3244_s30 + $0x112] sm:$0xff]  ;;  %v272_v22 = vld [vmem:[%s3244_s30 + $0xfa] sm:$0xff] }
  0x2f   : > { %v2551_v18 = vpack.i.bf16 %v268_v14, %v267_v13  ;;  %v273_v19 = vld [vmem:[%s3244_s30 + $0x10a] sm:$0xff]  ;;  %v271_v21 = vld [vmem:[%s3244_s30 + $0xf2] sm:$0xff]  ;;  %v277_v25 = vld [vmem:[%s3244_s30 + $0x13a] sm:$0xff] }
  0x30   : > { %2477 = vrot.lane.b32.xlu1 %v3288_v28, %s3154_s4  ;;  %v3378_v23 = vpack.i.bf16 %v274_v20, %v273_v19  ;;  %v3381_v24 = vpack.i.bf16 %v272_v22, %v271_v21  ;;  %v278_v26 = vld [vmem:[%s3244_s30 + $0x142] sm:$0xff]  ;;  %v281_v32 = vld [vmem:[%s3244_s30 + $0x16a] sm:$0xff]  ;;  %v282_v33 = vld [vmem:[%s3244_s30 + $0x172] sm:$0xff] }
  0x31   : > { %2472 = vrot.lane.b32.xlu0 %v2471_v29, %s3154_s4  ;;  %v275_v27 = vld [vmem:[%s3244_s30 + $0x122] sm:$0xff]  ;;  %v276_v29 = vld [vmem:[%s3244_s30 + $0x12a] sm:$0xff]  ;;  %v3389_v30 = vpack.i.bf16 %v278_v26, %v277_v25  ;;  %v279_v36 = vld [vmem:[%s3244_s30 + $0x152] sm:$0xff]  ;;  %v2586_v38 = vpack.i.bf16 %v282_v33, %v281_v32 }
  0x32   : > { %v3393_v31 = vpack.i.bf16 %v276_v29, %v275_v27  ;;  %v280_v37 = vld [vmem:[%s3244_s30 + $0x15a] sm:$0xff]  ;;  %v2055_v42 = vld [vmem:[%s3244_s30 + $0x30] sm:$0xff]  ;;  %v3422_v50 = vld [vmem:[%s3244_s30 + $0x68] sm:$0xff] }
  0x33   : > { %v3403_v39 = vpack.i.bf16 %v280_v37, %v279_v36  ;;  %v2056_v43 = vld [vmem:[%s3244_s30 + $0x38] sm:$0xff]  ;;  %v3411_v45 = vld [vmem:[%s3244_s30 + $0x20] sm:$0xff]  ;;  %v3425_v51 = vld [vmem:[%s3244_s30 + $0x48] sm:$0xff] }
  0x34   : > { %2487 = vrot.lane.b32.xlu1 %v3297_v34, %s3154_s4  ;;  %v3408_v44 = vld [vmem:[%s3244_s30 + $0x18] sm:$0xff]  ;;  %v3419_v49 = vld [vmem:[%s3244_s30 + $0x60] sm:$0xff]  ;;  %v3439_v56 = vld [vmem:[%s3244_s30 + $0x90] sm:$0xff] }
  0x35   : > { %2482 = vrot.lane.b32.xlu0 %v3300_v35, %s3154_s4  ;;  %v2591_v48 = vpack.i.bf16 %v3411_v45, %v3408_v44  ;;  %v3433_v54 = vpack.i.bf16 %v3422_v50, %v3419_v49  ;;  %v3442_v57 = vld [vmem:[%s3244_s30 + $0x98] sm:$0xff]  ;;  %v3448_v61 = vld [vmem:[%s3244_s30 + $0x80] sm:$0xff]  ;;  %v3465_v4 = vld [vmem:[%s3244_s30 + $0xc8] sm:$0xff] }
  0x36   : > { %v3445_v60 = vld [vmem:[%s3244_s30 + $0x78] sm:$0xff]  ;;  %v3454_v62 = vpack.i.bf16 %v3442_v57, %v3439_v56  ;;  %v3462_v2 = vld [vmem:[%s3244_s30 + $0xc0] sm:$0xff]  ;;  %v3468_v5 = vld [vmem:[%s3244_s30 + $0xa8] sm:$0xff] }
  0x37   : > { %v3459_v63 = vpack.i.bf16 %v3448_v61, %v3445_v60  ;;  %v3471_v6 = vld [vmem:[%s3244_s30 + $0xb0] sm:$0xff]  ;;  %v3487_v12 = vld [vmem:[%s3244_s30 + $0xf8] sm:$0xff]  ;;  %v3493_v14 = vld [vmem:[%s3244_s30 + $0xe0] sm:$0xff] }
  0x38   : > { %2497 = vrot.lane.b32.xlu1 %v3308_v40, %s3154_s4  ;;  %v3484_v9 = vld [vmem:[%s3244_s30 + $0xf0] sm:$0xff]  ;;  %4358 = vst [vmem:[#allocation6_spill] sm:$0xff] %v3487_v12  ;;  %v3490_v13 = vld [vmem:[%s3244_s30 + $0xd8] sm:$0xff]  ;;  %v3503_v20 = vld [vmem:[%s3244_s30 + $0x108] sm:$0xff] }
  0x39   : > { %2492 = vrot.lane.b32.xlu0 %v3312_v41, %s3154_s4  ;;  %4357 = vst [vmem:[#allocation5_spill] sm:$0xff] %v3484_v9  ;;  %v2631_v19 = vpack.i.bf16 %v3493_v14, %v3490_v13  ;;  %v3506_v21 = vld [vmem:[%s3244_s30 + $0x110] sm:$0xff] }
  0x3a   : > { %v2641_v22 = vpack.i.bf16 %v3506_v21, %v3503_v20 }
  0x3c   : > { %2507 = vrot.lane.b32.xlu1 %v2506_v46, %s3154_s4  ;;  %v2596_v46 = vpack.i.bf16 %v2056_v43, %v2055_v42 }
  0x3d   : > { %2502 = vrot.lane.b32.xlu0 %v3322_v47, %s3154_s4 }
  0x40   : > { %2517 = vrot.lane.b32.xlu1 %v3329_v52, %s3155_s5 }
  0x41   : > { %2512 = vrot.lane.b32.xlu0 %v2511_v53, %s3155_s5  ;;  %v3428_v53 = vld [vmem:[%s3244_s30 + $0x50] sm:$0xff] }
  0x42   : > { %v2601_v55 = vpack.i.bf16 %v3428_v53, %v3425_v51 }
  0x44   : > { %2527 = vrot.lane.b32.xlu1 %v3339_v58, %s3155_s5 }
  0x45   : > { %2522 = vrot.lane.b32.xlu0 %v3342_v59, %s3155_s5 }
  0x48   : > { %2537 = vrot.lane.b32.xlu1 %v3350_v0, %s3155_s5 }
  0x49   : > { %2532 = vrot.lane.b32.xlu0 %v3354_v1, %s3155_s5 }
  0x4c   : > { %2547 = vrot.lane.b32.xlu1 %v2546_v7, %s3155_s5  ;;  %v2626_v7 = vpack.i.bf16 %v3465_v4, %v3462_v2 }
  0x4d   : > { %2542 = vrot.lane.b32.xlu0 %v2541_v8, %s3155_s5  ;;  %v3481_v8 = vpack.i.bf16 %v3471_v6, %v3468_v5 }
  0x50   : > { %2557 = vrot.lane.b32.xlu1 %v3369_v15, %s3155_s5 }
  0x51   : > { %2552 = vrot.lane.b32.xlu0 %v2551_v18, %s3155_s5  ;;  %v2636_v18 = vpack.i.bf16 %v3487_v12, %v3484_v9  ;;  %v3621_v12 = vld [vmem:[%s3244_s30 + $0x140] sm:$0xff] }
  0x54   : > { %2567 = vrot.lane.b32.xlu1 %v3378_v23, %s3155_s5 }
  0x55   : > { %2562 = vrot.lane.b32.xlu0 %v3381_v24, %s3155_s5 }
  0x58   : > { %2577 = vrot.lane.b32.xlu1 %v3389_v30, %s3155_s5 }
  0x59   : > { %2572 = vrot.lane.b32.xlu0 %v3393_v31, %s3155_s5 }
  0x5c   : > { %2587 = vrot.lane.b32.xlu1 %v2586_v38, %s3155_s5 }
  0x5d   : > { %2582 = vrot.lane.b32.xlu0 %v3403_v39, %s3155_s5 }
  0x60   : > { %2597 = vrot.lane.b32.xlu1 %v2596_v46, %s3156_s6 }
  0x61   : > { %2592 = vrot.lane.b32.xlu0 %v2591_v48, %s3156_s6 }
  0x64   : > { %2607 = vrot.lane.b32.xlu1 %v3433_v54, %s3156_s6 }
  0x65   : > { %2602 = vrot.lane.b32.xlu0 %v2601_v55, %s3156_s6 }
  0x68   : > { %2617 = vrot.lane.b32.xlu1 %v3454_v62, %s3156_s6 }
  0x69   : > { %2612 = vrot.lane.b32.xlu0 %v3459_v63, %s3156_s6 }
  0x6c   : > { %2627 = vrot.lane.b32.xlu1 %v2626_v7, %s3156_s6 }
  0x6d   : > { %2622 = vrot.lane.b32.xlu0 %v3481_v8, %s3156_s6 }
  0x70   : > { %2637 = vrot.lane.b32.xlu1 %v2636_v18, %s3156_s6 }
  0x71   : > { %2632 = vrot.lane.b32.xlu0 %v2631_v19, %s3156_s6 }
  0x74   : > { %2647 = vrot.lane.b32.xlu1 %v3288_v28, %s3157_s7 }
  0x75   : > { %2642 = vrot.lane.b32.xlu0 %v2641_v22, %s3156_s6 }
  0x78   : > { %2657 = vrot.lane.b32.xlu1 %v3369_v15, %s3158_s8  ;;  %v3558_v15 = vld [vmem:[%s3244_s30 + $0x120] sm:$0xff] }
  0x79   : > { %2652 = vrot.lane.b32.xlu0 %v3261_v11, %s3157_s7 }
  0x7c   : > { %2667 = vrot.lane.b32.xlu1 %v2636_v18, %s3159_s9 }
  0x7d   : > { %2662 = vrot.lane.b32.xlu0 %v3329_v52, %s3158_s8 }
  0x80   : > { %2677 = vrot.lane.b32.xlu1 %v3300_v35, %s3160_s10 }
  0x81   : > { %2672 = vrot.lane.b32.xlu0 %v2596_v46, %s3159_s9 }
  0x84   : > { %2687 = vrot.lane.b32.xlu1 %v3381_v24, %s3161_s11 }
  0x85   : > { %2682 = vrot.lane.b32.xlu0 %v3249_v3, %s3160_s10 }
  0x88   : > { %2697 = vrot.lane.b32.xlu1 %v3300_v35, %s3157_s7 }
  0x89   : > { %2692 = vrot.lane.b32.xlu0 %v3342_v59, %s3161_s11 }
  0x8c   : > { %2707 = vrot.lane.b32.xlu1 %v3381_v24, %s3158_s8  ;;  %v3561_v24 = vld [vmem:[%s3244_s30 + $0x128] sm:$0xff] }
  0x8d   : > { %2702 = vrot.lane.b32.xlu0 %v3249_v3, %s3157_s7  ;;  %v2766_v27 = vpack.i.bf16 %v3561_v24, %v3558_v15 }
  0x90   : > { %2717 = vrot.lane.b32.xlu1 %v2641_v22, %s3159_s9 }
  0x91   : > { %2712 = vrot.lane.b32.xlu0 %v3342_v59, %s3158_s8 }
  0x92   : > { %v3540_v11 = vpop.permute.xlu1 %2442 }
  0x93   : > { %v3542_v28 = vpop.permute.xlu0 %2432 }
  0x94   : > { %2727 = vrot.lane.b32.xlu1 %v3297_v34, %s3160_s10 }
  0x95   : > { %2722 = vrot.lane.b32.xlu0 %v2601_v55, %s3159_s9 }
  0x96   : > { %v2448_v35 = vpop.permute.xlu1 %2447 }
  0x97   : > { %v3547_v52 = vpop.permute.xlu0 %2437  ;;  %v2450_v42 = vunpack.i.h.bf16 %v2448_v35  ;;  %v2449_v43 = vunpack.i.l.bf16 %v2448_v35 }
  0x98   : > { %2737 = vrot.lane.b32.xlu1 %v3378_v23, %s3161_s11 }
  0x99   : > { %2732 = vrot.lane.b32.xlu0 %v3258_v10, %s3160_s10  ;;  %v1513_v35 = vsel %vm1505_vm0, %v3428_v53, %v2450_v42 }
  0x9a   : > { %v2458_v3 = vpop.permute.xlu1 %2457 }
  0x9b   : > { %v2453_v59 = vpop.permute.xlu0 %2452  ;;  %v2460_v46 = vunpack.i.h.bf16 %v2458_v3  ;;  %v2459_v48 = vunpack.i.l.bf16 %v2458_v3 }
  0x9c   : > { %2747 = vrot.lane.b32.xlu1 %v3297_v34, %s3157_s7  ;;  %v2455_v55 = vunpack.i.h.bf16 %v2453_v59  ;;  %v2454_v7 = vunpack.i.l.bf16 %v2453_v59 }
  0x9d   : > { %2742 = vrot.lane.b32.xlu0 %v3339_v58, %s3161_s11  ;;  %v1516_v53 = vsel %vm1505_vm0, %v3445_v60, %v2459_v48  ;;  %v1517_v59 = vsel %vm1505_vm0, %v3448_v61, %v2460_v46 }
  0x9e   : > { %v3563_v25 = vpop.permute.xlu1 %2467 }
  0x9f   : > { %v3565_v26 = vpop.permute.xlu0 %2462 }
  0xa0   : > { %2757 = vrot.lane.b32.xlu1 %v3378_v23, %s3158_s8  ;;  %v2465_v60 = vunpack.i.h.bf16 %v3565_v26  ;;  %v2464_v61 = vunpack.i.l.bf16 %v3565_v26 }
  0xa1   : > { %2752 = vrot.lane.b32.xlu0 %v3258_v10, %s3157_s7 }
  0xa2   : > { %v3573_v34 = vpop.permute.xlu1 %2477 }
  0xa3   : > { %v3575_v29 = vpop.permute.xlu0 %2472 }
  0xa4   : > { %2767 = vrot.lane.b32.xlu1 %v2766_v27, %s3159_s9 }
  0xa5   : > { %2762 = vrot.lane.b32.xlu0 %v3339_v58, %s3158_s8 }
  0xa6   : > { %v3580_v32 = vpop.permute.xlu1 %2487 }
  0xa7   : > { %v3582_v33 = vpop.permute.xlu0 %2482 }
  0xa8   : > { %2777 = vrot.lane.b32.xlu1 %v3312_v41, %s3160_s10 }
  0xa9   : > { %2772 = vrot.lane.b32.xlu0 %v3433_v54, %s3159_s9 }
  0xaa   : > { %v3588_v10 = vpop.permute.xlu1 %2497 }
  0xab   : > { %v3590_v23 = vpop.permute.xlu0 %2492 }
  0xac   : > { %2787 = vrot.lane.b32.xlu1 %v3393_v31, %s3161_s11 }
  0xad   : > { %2782 = vrot.lane.b32.xlu0 %v3273_v17, %s3160_s10 }
  0xae   : > { %v3596_v58 = vpop.permute.xlu1 %2507 }
  0xaf   : > { %v3598_v36 = vpop.permute.xlu0 %2502 }
  0xb0   : > { %2797 = vrot.lane.b32.xlu1 %v2766_v27, %s3156_s6  ;;  %v1512_v27 = vsel %vm1505_vm0, %v3425_v51, %v2449_v43  ;;  %v1515_v43 = vsel %vm1505_vm0, %v3422_v50, %v2455_v55 }
  0xb1   : > { %2792 = vrot.lane.b32.xlu0 %v3354_v1, %s3161_s11 }
  0xb2   : > { %v3603_v37 = vpop.permute.xlu1 %2517 }
  0xb3   : > { %v3605_v38 = vpop.permute.xlu0 %2512 }
  0xb4   : > { %2807 = vrot.lane.b32.xlu1 %v3273_v17, %s3157_s7  ;;  %v3618_v17 = vld [vmem:[%s3244_s30 + $0x138] sm:$0xff] }
  0xb5   : > { %2802 = vrot.lane.b32.xlu0 %v3312_v41, %s3157_s7  ;;  %v2821_v51 = vpack.i.bf16 %v3621_v12, %v3618_v17 }
  0xb6   : > { %v2528_v54 = vpop.permute.xlu1 %2527 }
  0xb7   : > { %v2530_v18 = vunpack.i.h.bf16 %v2528_v54  ;;  %v2529_v19 = vunpack.i.l.bf16 %v2528_v54  ;;  %v3611_v22 = vpop.permute.xlu0 %2522 }
  0xb8   : > { %2817 = vrot.lane.b32.xlu1 %v3354_v1, %s3158_s8  ;;  %v1514_v1 = vsel %vm1505_vm0, %v3419_v49, %v2454_v7 }
  0xb9   : > { %v3626_v41 = vsel %vm1538_vm1, %v1512_v27, %v2529_v19  ;;  %v3629_v3 = vsel %vm1538_vm1, %v1513_v35, %v2530_v18  ;;  %2812 = vrot.lane.b32.xlu0 %v3393_v31, %s3158_s8  ;;  %v2470_v31 = vunpack.i.h.bf16 %v3563_v25  ;;  %v2469_v27 = vunpack.i.l.bf16 %v3563_v25 }
  0xba   : > { %v2538_v42 = vpop.permute.xlu1 %2537 }
  0xbb   : > { %v2540_v54 = vunpack.i.h.bf16 %v2538_v42  ;;  %v2539_v18 = vunpack.i.l.bf16 %v2538_v42  ;;  %v2533_v19 = vpop.permute.xlu0 %2532  ;;  %v1520_v26 = vsel %vm1505_vm0, %v3468_v5, %v2469_v27 }
  0xbc   : > { %v2535_v35 = vunpack.i.h.bf16 %v2533_v19  ;;  %v2534_v9 = vunpack.i.l.bf16 %v2533_v19  ;;  %2827 = vrot.lane.b32.xlu1 %v3459_v63, %s3159_s9  ;;  %v2500_v19 = vunpack.i.h.bf16 %v3588_v10 }
  0xbd   : > { %v3650_v49 = vsel %vm1538_vm1, %v1516_v53, %v2539_v18  ;;  %v3653_v50 = vsel %vm1538_vm1, %v1517_v59, %v2540_v54  ;;  %2822 = vrot.lane.b32.xlu0 %v2821_v51, %s3159_s9  ;;  %v1521_v53 = vsel %vm1505_vm0, %v3471_v6, %v2470_v31  ;;  %v2489_v18 = vunpack.i.l.bf16 %v3580_v32 }
  0xbe   : > { %v3657_v46 = vsel %vm1538_vm1, %v1514_v1, %v2534_v9  ;;  %v3660_v25 = vsel %vm1538_vm1, %v1515_v43, %v2535_v35  ;;  %v2548_v48 = vpop.permute.xlu1 %2547  ;;  %v1518_v9 = vsel %vm1505_vm0, %v3439_v56, %v2464_v61  ;;  %v1519_v1 = vsel %vm1505_vm0, %v3442_v57, %v2465_v60  ;;  %v2093_v35 = vld [vmem:[%s3244_s30 + $0x79] sm:$0xff]  ;;  %v2094_v60 = vld [vmem:[%s3244_s30 + $0x81] sm:$0xff] }
  0xbf   : > { %v2550_v63 = vunpack.i.h.bf16 %v2548_v48  ;;  %v2549_v55 = vunpack.i.l.bf16 %v2548_v48  ;;  %v2543_v7 = vpop.permute.xlu0 %2542  ;;  %v2490_v57 = vunpack.i.h.bf16 %v3580_v32  ;;  %v2499_v31 = vunpack.i.l.bf16 %v3588_v10  ;;  %v215_v10 = vld [vmem:[%s3244_s30 + $0x150] sm:$0xff] }
  0xc0   : > { %v2545_v59 = vunpack.i.h.bf16 %v2543_v7  ;;  %v2544_v42 = vunpack.i.l.bf16 %v2543_v7  ;;  %2837 = vrot.lane.b32.xlu1 %v3269_v16, %s3160_s10  ;;  %v2495_v61 = vunpack.i.h.bf16 %v3590_v23  ;;  %v2494_v48 = vunpack.i.l.bf16 %v3590_v23 }
  0xc1   : > { %v3673_v43 = vsel %vm1538_vm1, %v1520_v26, %v2549_v55  ;;  %v3676_v5 = vsel %vm1538_vm1, %v1521_v53, %v2550_v63  ;;  %2832 = vrot.lane.b32.xlu0 %v3308_v40, %s3160_s10  ;;  %v1528_v7 = vsel %vm1505_vm0, %v3503_v20, %v2489_v18  ;;  %v1529_v26 = vsel %vm1505_vm0, %v3506_v21, %v2490_v57  ;;  %v216_v53 = vld [vmem:[%s3244_s30 + $0x158] sm:$0xff] }
  0xc2   : > { %v3681_v6 = vsel %vm1538_vm1, %v1518_v9, %v2544_v42  ;;  %v3684_v16 = vsel %vm1538_vm1, %v1519_v1, %v2545_v59  ;;  %v3686_v56 = vpop.permute.xlu1 %2557  ;;  %v2861_v42 = vpack.i.bf16 %v2094_v60, %v2093_v35  ;;  %v1532_v20 = vsel %vm1505_vm0, %v3618_v17, %v2499_v31 }
  0xc3   : > { %v3688_v54 = vpop.permute.xlu0 %2552  ;;  %v1533_v21 = vsel %vm1505_vm0, %v3621_v12, %v2500_v19  ;;  %v2876_v9 = vpack.i.bf16 %v216_v53, %v215_v10  ;;  %v1530_v1 = vsel %vm1505_vm0, %v3558_v15, %v2494_v48  ;;  %v1531_v57 = vsel %vm1505_vm0, %v3561_v24, %v2495_v61  ;;  %v3732_v12 = vld [vmem:[%s3244_s30 + $0x168] sm:$0xff]  ;;  %v3735_v19 = vld [vmem:[%s3244_s30 + $0x170] sm:$0xff] }
  0xc4   : > { %2847 = vrot.lane.b32.xlu1 %v3350_v0, %s3161_s11  ;;  %v2510_v35 = vunpack.i.h.bf16 %v3596_v58  ;;  %v2509_v60 = vunpack.i.l.bf16 %v3596_v58  ;;  %v2505_v15 = vunpack.i.h.bf16 %v3598_v36  ;;  %v2504_v24 = vunpack.i.l.bf16 %v3598_v36 }
  0xc5   : > { %2842 = vrot.lane.b32.xlu0 %v3389_v30, %s3161_s11 }
  0xc6   : > { %v2568_v27 = vpop.permute.xlu1 %2567 }
  0xc7   : > { %v2570_v32 = vunpack.i.h.bf16 %v2568_v27  ;;  %v2569_v63 = vunpack.i.l.bf16 %v2568_v27  ;;  %v3702_v55 = vpop.permute.xlu0 %2562 }
  0xc8   : > { %2857 = vrot.lane.b32.xlu1 %v3308_v40, %s3157_s7 }
  0xc9   : > { %v3713_v59 = vsel %vm1538_vm1, %v1528_v7, %v2569_v63  ;;  %v3716_v23 = vsel %vm1538_vm1, %v1529_v26, %v2570_v32  ;;  %2852 = vrot.lane.b32.xlu0 %v2821_v51, %s3156_s6  ;;  %v1536_v26 = vsel %vm1505_vm0, %v3732_v12, %v2509_v60  ;;  %v2190_v60 = vld [vmem:[%s3244_s30 + $0x99] sm:$0xff] }
  0xca   : > { %v2578_v40 = vpop.permute.xlu1 %2577 }
  0xcb   : > { %v2580_v18 = vunpack.i.h.bf16 %v2578_v40  ;;  %v2579_v27 = vunpack.i.l.bf16 %v2578_v40  ;;  %v2573_v51 = vpop.permute.xlu0 %2572  ;;  %v1534_v40 = vsel %vm1505_vm0, %v215_v10, %v2504_v24  ;;  %v2189_v10 = vld [vmem:[%s3244_s30 + $0x91] sm:$0xff] }
  0xcc   : > { %v2575_v32 = vunpack.i.h.bf16 %v2573_v51  ;;  %v2574_v17 = vunpack.i.l.bf16 %v2573_v51  ;;  %2867 = vrot.lane.b32.xlu1 %v3389_v30, %s3158_s8 }
  0xcd   : > { %v3740_v31 = vsel %vm1538_vm1, %v1532_v20, %v2579_v27  ;;  %v3743_v61 = vsel %vm1538_vm1, %v1533_v21, %v2580_v18  ;;  %2862 = vrot.lane.b32.xlu0 %v2861_v42, %s3157_s7  ;;  %v1537_v20 = vsel %vm1505_vm0, %v3735_v19, %v2510_v35 }
  0xce   : > { %v3747_v58 = vsel %vm1538_vm1, %v1530_v1, %v2574_v17  ;;  %v3750_v30 = vsel %vm1538_vm1, %v1531_v57, %v2575_v32  ;;  %v2588_v48 = vpop.permute.xlu1 %2587  ;;  %v1535_v1 = vsel %vm1505_vm0, %v216_v53, %v2505_v15  ;;  %v2221_v17 = vld [vmem:[%s3244_s30 + $0x92] sm:$0xff]  ;;  %v2222_v15 = vld [vmem:[%s3244_s30 + $0x9a] sm:$0xff] }
  0xcf   : > { %v2590_v63 = vunpack.i.h.bf16 %v2588_v48  ;;  %v2589_v7 = vunpack.i.l.bf16 %v2588_v48  ;;  %v2583_v36 = vpop.permute.xlu0 %2582 }
  0xd0   : > { %v2585_v21 = vunpack.i.h.bf16 %v2583_v36  ;;  %v2584_v42 = vunpack.i.l.bf16 %v2583_v36  ;;  %2877 = vrot.lane.b32.xlu1 %v2876_v9, %s3159_s9 }
  0xd1   : > { %v3760_v57 = vsel %vm1538_vm1, %v1536_v26, %v2589_v7  ;;  %v3763_v18 = vsel %vm1538_vm1, %v1537_v20, %v2590_v63  ;;  %2872 = vrot.lane.b32.xlu0 %v3350_v0, %s3158_s8  ;;  %v2891_v0 = vpack.i.bf16 %v2190_v60, %v2189_v10  ;;  %v2901_v7 = vpack.i.bf16 %v2222_v15, %v2221_v17  ;;  %v2111_v26 = vld [vmem:[%s3244_s30 + $0x151] sm:$0xff]  ;;  %v2112_v20 = vld [vmem:[%s3244_s30 + $0x159] sm:$0xff] }
  0xd2   : > { %4359 = vst [vmem:[#allocation7_spill] sm:$0xff] %v3760_v57  ;;  %4360 = vst [vmem:[#allocation8_spill] sm:$0xff] %v3763_v18  ;;  %v3768_v27 = vsel %vm1538_vm1, %v1534_v40, %v2584_v42  ;;  %v3771_v51 = vsel %vm1538_vm1, %v1535_v1, %v2585_v21  ;;  %v3773_v35 = vpop.permute.xlu1 %2597  ;;  %v2911_v10 = vpack.i.bf16 %v2112_v20, %v2111_v26  ;;  %v2143_v17 = vld [vmem:[%s3244_s30 + $0x152] sm:$0xff]  ;;  %v2144_v15 = vld [vmem:[%s3244_s30 + $0x15a] sm:$0xff]  ;;  %v2554_v18 = vunpack.i.l.bf16 %v3688_v54 }
  0xd3   : > { %4361 = vst [vmem:[#allocation9_spill] sm:$0xff] %v3771_v51  ;;  %v3777_v53 = vpop.permute.xlu0 %2592  ;;  %v2921_v26 = vpack.i.bf16 %v2144_v15, %v2143_v17  ;;  %v2239_v17 = vld [vmem:[%s3244_s30 + $0x16a] sm:$0xff]  ;;  %v2240_v15 = vld [vmem:[%s3244_s30 + $0x172] sm:$0xff] }
  0xd4   : > { %2887 = vrot.lane.b32.xlu1 %v3322_v47, %s3160_s10 }
  0xd5   : > { %2882 = vrot.lane.b32.xlu0 %v3454_v62, %s3159_s9 }
  0xd6   : > { %v2608_v32 = vpop.permute.xlu1 %2607 }
  0xd7   : > { %v2610_v24 = vunpack.i.h.bf16 %v2608_v32  ;;  %v2609_v48 = vunpack.i.l.bf16 %v2608_v32  ;;  %v3785_v63 = vpop.permute.xlu0 %2602 }
  0xd8   : > { %2897 = vrot.lane.b32.xlu1 %v3403_v39, %s3161_s11 }
  0xd9   : > { %v3791_v47 = vsel %vm1571_vm2, %v3626_v41, %v2609_v48  ;;  %v3795_v62 = vsel %vm1571_vm2, %v3629_v3, %v2610_v24  ;;  %2892 = vrot.lane.b32.xlu0 %v2891_v0, %s3160_s10 }
  0xda   : > { %v2618_v36 = vpop.permute.xlu1 %2617 }
  0xdb   : > { %v2620_v21 = vunpack.i.h.bf16 %v2618_v36  ;;  %v2619_v42 = vunpack.i.l.bf16 %v2618_v36  ;;  %v2613_v40 = vpop.permute.xlu0 %2612 }
  0xdc   : > { %v2615_v39 = vunpack.i.h.bf16 %v2613_v40  ;;  %v2614_v1 = vunpack.i.l.bf16 %v2613_v40  ;;  %2907 = vrot.lane.b32.xlu1 %v2876_v9, %s3156_s6  ;;  %v2207_v40 = vld [vmem:[%s3244_s30 + $0x169] sm:$0xff] }
  0xdd   : > { %v3803_v41 = vsel %vm1571_vm2, %v3650_v49, %v2619_v42  ;;  %v3807_v3 = vsel %vm1571_vm2, %v3653_v50, %v2620_v21  ;;  %2902 = vrot.lane.b32.xlu0 %v2901_v7, %s3161_s11  ;;  %v2192_v42 = vld [vmem:[%s3244_s30 + $0xb1] sm:$0xff] }
  0xde   : > { %v3812_v60 = vsel %vm1571_vm2, %v3657_v46, %v2614_v1  ;;  %v3816_v32 = vsel %vm1571_vm2, %v3660_v25, %v2615_v39  ;;  %v2628_v9 = vpop.permute.xlu1 %2627  ;;  %v2208_v39 = vld [vmem:[%s3244_s30 + $0x171] sm:$0xff] }
  0xdf   : > { %v2630_v49 = vunpack.i.h.bf16 %v2628_v9  ;;  %v2629_v24 = vunpack.i.l.bf16 %v2628_v9  ;;  %v2623_v48 = vpop.permute.xlu0 %2622 }
  0xe0   : > { %v2625_v50 = vunpack.i.h.bf16 %v2623_v48  ;;  %v2624_v36 = vunpack.i.l.bf16 %v2623_v48  ;;  %2917 = vrot.lane.b32.xlu1 %v2891_v0, %s3157_s7  ;;  %v2177_v48 = vld [vmem:[%s3244_s30 + $0x180] sm:$0xff] }
  0xe1   : > { %v3823_v46 = vsel %vm1571_vm2, %v3673_v43, %v2629_v24  ;;  %v3827_v25 = vsel %vm1571_vm2, %v3676_v5, %v2630_v49  ;;  %2912 = vrot.lane.b32.xlu0 %v2911_v10, %s3157_s7  ;;  %v3846_v5 = vpack.i.bf16 %v3735_v19, %v3732_v12  ;;  %v2941_v12 = vpack.i.bf16 %v2208_v39, %v2207_v40  ;;  %v2223_v19 = vld [vmem:[%s3244_s30 + $0xaa] sm:$0xff]  ;;  %v2224_v10 = vld [vmem:[%s3244_s30 + $0xb2] sm:$0xff] }
  0xe2   : > { %4362 = vst [vmem:[#allocation10_spill] sm:$0xff] %v3823_v46  ;;  %4363 = vst [vmem:[#allocation11_spill] sm:$0xff] %v3827_v25  ;;  %v3832_v20 = vsel %vm1571_vm2, %v3681_v6, %v2624_v36  ;;  %v3836_v21 = vsel %vm1571_vm2, %v3684_v16, %v2625_v50  ;;  %v3838_v0 = vpop.permute.xlu1 %2637  ;;  %v2191_v6 = vld [vmem:[%s3244_s30 + $0xa9] sm:$0xff]  ;;  %v2435_v49 = vunpack.i.h.bf16 %v3542_v28  ;;  %v2434_v24 = vunpack.i.l.bf16 %v3542_v28  ;;  %v187_v36 = vld [vmem:[%s3244_s30] sm:$0xff] }
  0xe3   : > { %4364 = vst [vmem:[#allocation12_spill] sm:$0xff] %v3832_v20  ;;  %4365 = vst [vmem:[#allocation13_spill] sm:$0xff] %v3836_v21  ;;  %v3840_v43 = vpop.permute.xlu0 %2632  ;;  %v2178_v50 = vld [vmem:[%s3244_s30 + $0x188] sm:$0xff]  ;;  %v3880_v40 = vpack.i.bf16 %v2224_v10, %v2223_v19  ;;  %v2515_v28 = vunpack.i.h.bf16 %v3605_v38  ;;  %v2514_v39 = vunpack.i.l.bf16 %v3605_v38  ;;  %v2951_v25 = vpack.i.bf16 %v2240_v15, %v2239_v17 }
  0xe4   : > { %2927 = vrot.lane.b32.xlu1 %v2901_v7, %s3158_s8  ;;  %v3858_v7 = vpack.i.bf16 %v2192_v42, %v2191_v6  ;;  %v2475_v6 = vunpack.i.h.bf16 %v3575_v29  ;;  %v2474_v42 = vunpack.i.l.bf16 %v3575_v29  ;;  %v2555_v46 = vunpack.i.h.bf16 %v3688_v54 }
  0xe5   : > { %2922 = vrot.lane.b32.xlu0 %v2921_v26, %s3158_s8  ;;  %v188_v26 = vld [vmem:[%s3244_s30 + $0x8] sm:$0xff]  ;;  %v3887_v29 = vpack.i.bf16 %v2178_v50, %v2177_v48  ;;  %v1506_v19 = vsel %vm1505_vm0, %v187_v36, %v2434_v24  ;;  %v2595_v21 = vunpack.i.h.bf16 %v3777_v53  ;;  %v2594_v38 = vunpack.i.l.bf16 %v3777_v53 }
  0xe6   : > { %v3850_v16 = vpop.permute.xlu1 %2647  ;;  %v1507_v10 = vsel %vm1505_vm0, %v188_v26, %v2435_v49  ;;  %v1522_v17 = vsel %vm1505_vm0, %v3462_v2, %v2474_v42  ;;  %v1523_v54 = vsel %vm1505_vm0, %v3465_v4, %v2475_v6  ;;  %v2635_v15 = vunpack.i.h.bf16 %v3840_v43 }
  0xe7   : > { %v3854_v1 = vpop.permute.xlu0 %2642  ;;  %v2634_v48 = vunpack.i.l.bf16 %v3840_v43  ;;  %v1539_v49 = vsel %vm1538_vm1, %v1506_v19, %v2514_v39  ;;  %v1540_v24 = vsel %vm1538_vm1, %v1507_v10, %v2515_v28  ;;  %v2650_v53 = vunpack.i.h.bf16 %v3850_v16 }
  0xe8   : > { %2937 = vrot.lane.b32.xlu1 %v3481_v8, %s3159_s9  ;;  %v2649_v50 = vunpack.i.l.bf16 %v3850_v16  ;;  %v1555_v2 = vsel %vm1538_vm1, %v1522_v17, %v2554_v18  ;;  %v1556_v4 = vsel %vm1538_vm1, %v1523_v54, %v2555_v46  ;;  %v1572_v6 = vsel %vm1571_vm2, %v1539_v49, %v2594_v38 }
  0xe9   : > { %2932 = vrot.lane.b32.xlu0 %v3846_v5, %s3159_s9  ;;  %v1573_v42 = vsel %vm1571_vm2, %v1540_v24, %v2595_v21  ;;  %v1588_v16 = vsel %vm1571_vm2, %v1555_v2, %v2634_v48  ;;  %v1589_v10 = vsel %vm1571_vm2, %v1556_v4, %v2635_v15 }
  0xea   : > { %v3864_v9 = vpop.permute.xlu1 %2657  ;;  %v1621_v46 = vsel %vm1604_vm3, %v1588_v16, %v2649_v50 }
  0xeb   : > { %v3870_v8 = vpop.permute.xlu0 %2652  ;;  %v2660_v36 = vunpack.i.h.bf16 %v3864_v9  ;;  %v2659_v43 = vunpack.i.l.bf16 %v3864_v9  ;;  %v1622_v9 = vsel %vm1604_vm3, %v1589_v10, %v2650_v53 }
  0xec   : > { %2947 = vrot.lane.b32.xlu1 %v3858_v7, %s3160_s10  ;;  %v2655_v17 = vunpack.i.h.bf16 %v3870_v8  ;;  %v2654_v38 = vunpack.i.l.bf16 %v3870_v8 }
  0xed   : > { %2942 = vrot.lane.b32.xlu0 %v2941_v12, %s3160_s10  ;;  %v1655_v21 = vsel %vm1637_vm4, %v1622_v9, %v2660_v36  ;;  %v2209_v36 = vld [vmem:[%s3244_s30 + $0x181] sm:$0xff] }
  0xee   : > { %v2668_v57 = vpop.permute.xlu1 %2667 }
  0xef   : > { %v3893_v20 = vpop.permute.xlu0 %2662  ;;  %v2670_v28 = vunpack.i.h.bf16 %v2668_v57  ;;  %v2669_v39 = vunpack.i.l.bf16 %v2668_v57  ;;  %v1654_v57 = vsel %vm1637_vm4, %v1621_v46, %v2659_v43 }
  0xf0   : > { %2957 = vrot.lane.b32.xlu1 %v3880_v40, %s3161_s11  ;;  %v2665_v54 = vunpack.i.h.bf16 %v3893_v20 }
  0xf1   : > { %2952 = vrot.lane.b32.xlu0 %v2951_v25, %s3161_s11  ;;  %v1687_v48 = vsel %vm1670_vm5, %v1654_v57, %v2669_v39  ;;  %v1688_v49 = vsel %vm1670_vm5, %v1655_v21, %v2670_v28 }
  0xf2   : > { %v2678_v26 = vpop.permute.xlu1 %2677 }
  0xf3   : > { %v2673_v19 = vpop.permute.xlu0 %2672  ;;  %v2680_v51 = vunpack.i.h.bf16 %v2678_v26  ;;  %v2679_v18 = vunpack.i.l.bf16 %v2678_v26 }
  0xf4   : > { %2967 = vrot.lane.b32.xlu1 %v2941_v12, %s3157_s7  ;;  %v2664_v12 = vunpack.i.l.bf16 %v3893_v20  ;;  %v2675_v50 = vunpack.i.h.bf16 %v2673_v19  ;;  %v2210_v20 = vld [vmem:[%s3244_s30 + $0x189] sm:$0xff] }
  0xf5   : > { %2962 = vrot.lane.b32.xlu0 %v3846_v5, %s3156_s6  ;;  %v2674_v5 = vunpack.i.l.bf16 %v2673_v19  ;;  %v1720_v2 = vsel %vm1703_vm6, %v1687_v48, %v2679_v18  ;;  %v1721_v4 = vsel %vm1703_vm6, %v1688_v49, %v2680_v51  ;;  %v1605_v19 = vsel %vm1604_vm3, %v1572_v6, %v2654_v38  ;;  %v2161_v18 = vld [vmem:[%s3244_s30 + $0xc0] sm:$0xff]  ;;  %v2242_v49 = vld [vmem:[%s3244_s30 + $0x18a] sm:$0xff] }
  0xf6   : > { %v2688_v15 = vpop.permute.xlu1 %2687  ;;  %v1606_v51 = vsel %vm1604_vm3, %v1573_v42, %v2655_v17  ;;  %v1638_v46 = vsel %vm1637_vm4, %v1605_v19, %v2664_v12  ;;  %v3952_v21 = vpack.i.bf16 %v2210_v20, %v2209_v36  ;;  %v2241_v48 = vld [vmem:[%s3244_s30 + $0x182] sm:$0xff]  ;;  %v2520_v19 = vunpack.i.h.bf16 %v3603_v37 }
  0xf7   : > { %v2690_v24 = vunpack.i.h.bf16 %v2688_v15  ;;  %v2689_v8 = vunpack.i.l.bf16 %v2688_v15  ;;  %v2683_v53 = vpop.permute.xlu0 %2682  ;;  %v1639_v9 = vsel %vm1637_vm4, %v1606_v51, %v2665_v54  ;;  %v1671_v15 = vsel %vm1670_vm5, %v1638_v46, %v2674_v5  ;;  %v2194_v5 = vld [vmem:[%s3244_s30 + $0xc9] sm:$0xff] }
  0xf8   : > { %2977 = vrot.lane.b32.xlu1 %v2951_v25, %s3158_s8  ;;  %v2685_v43 = vunpack.i.h.bf16 %v2683_v53  ;;  %v2684_v26 = vunpack.i.l.bf16 %v2683_v53  ;;  %v1672_v6 = vsel %vm1670_vm5, %v1639_v9, %v2675_v50  ;;  %v2193_v50 = vld [vmem:[%s3244_s30 + $0xc1] sm:$0xff]  ;;  %v2519_v51 = vunpack.i.l.bf16 %v3603_v37 }
  0xf9   : > { %2972 = vrot.lane.b32.xlu0 %v3858_v7, %s3157_s7  ;;  %v1753_v28 = vsel %vm1736_vm7, %v1720_v2, %v2689_v8  ;;  %v1754_v39 = vsel %vm1736_vm7, %v1721_v4, %v2690_v24  ;;  %v2162_v7 = vld [vmem:[%s3244_s30 + $0xc8] sm:$0xff]  ;;  %v2440_v2 = vunpack.i.h.bf16 %v3547_v52  ;;  %v2439_v4 = vunpack.i.l.bf16 %v3547_v52 }
  0xfa   : > { %v3946_v16 = vpop.permute.xlu1 %2697  ;;  %v2318_v10 = vpack.c.bf16 %v1754_v39, %v1753_v28  ;;  %v1704_v38 = vsel %vm1703_vm6, %v1671_v15, %v2684_v26  ;;  %v1705_v54 = vsel %vm1703_vm6, %v1672_v6, %v2685_v43  ;;  %v2991_v12 = vpack.i.bf16 %v2162_v7, %v2161_v18  ;;  %v2225_v43 = vld [vmem:[%s3244_s30 + $0xc2] sm:$0xff]  ;;  %v2226_v26 = vld [vmem:[%s3244_s30 + $0xca] sm:$0xff] }
  0xfb   : > { %v2693_v57 = vpop.permute.xlu0 %2692  ;;  %v2479_v28 = vunpack.i.l.bf16 %v3573_v34  ;;  %v3980_v39 = vpack.i.bf16 %v2242_v49, %v2241_v48  ;;  %v3001_v52 = vpack.i.bf16 %v2194_v5, %v2193_v50  ;;  %v2559_v18 = vunpack.i.l.bf16 %v3686_v56 }
  0xfc   : > { %v2695_v42 = vunpack.i.h.bf16 %v2693_v57  ;;  %v2694_v17 = vunpack.i.l.bf16 %v2693_v57  ;;  %2987 = vrot.lane.b32.xlu1 %v3887_v29, %s3159_s9  ;;  %2320 = vmatprep.subr.msk.bf16.mxu0 %vm3940_vm9, %v2318_v10  ;;  %v2560_v10 = vunpack.i.h.bf16 %v3686_v56  ;;  %v3989_v7 = vpack.i.bf16 %v2226_v26, %v2225_v43 }
  0xfd   : > { %2982 = vrot.lane.b32.xlu0 %v3880_v40, %s3158_s8  ;;  %v2480_v40 = vunpack.i.h.bf16 %v3573_v34  ;;  %v1508_v46 = vsel %vm1505_vm0, %v3408_v44, %v2439_v4  ;;  %v1509_v9 = vsel %vm1505_vm0, %v3411_v45, %v2440_v2  ;;  %v2600_v37 = vunpack.i.h.bf16 %v3773_v35 }
  0xfe   : > { %v2708_v24 = vpop.permute.xlu1 %2707  ;;  %v1737_v8 = vsel %vm1736_vm7, %v1704_v38, %v2694_v17  ;;  %v1738_v53 = vsel %vm1736_vm7, %v1705_v54, %v2695_v42  ;;  %v2599_v57 = vunpack.i.l.bf16 %v3773_v35  ;;  %v1524_v6 = vsel %vm1505_vm0, %v3490_v13, %v2479_v28 }
  0xff   : > { %v3972_v36 = vpop.permute.xlu0 %2702  ;;  %v2321_v20 = vpack.c.bf16 %v1738_v53, %v1737_v8  ;;  %v1525_v56 = vsel %vm1505_vm0, %v3493_v14, %v2480_v40  ;;  %v2640_v42 = vunpack.i.h.bf16 %v3838_v0  ;;  %v2639_v17 = vunpack.i.l.bf16 %v3838_v0 }
 0x100   : > { %2997 = vrot.lane.b32.xlu1 %v3952_v21, %s3160_s10  ;;  %v1541_v44 = vsel %vm1538_vm1, %v1508_v46, %v2519_v51  ;;  %v1542_v45 = vsel %vm1538_vm1, %v1509_v9, %v2520_v19  ;;  %v2700_v35 = vunpack.i.h.bf16 %v3946_v16  ;;  %v2699_v38 = vunpack.i.l.bf16 %v3946_v16 }
 0x101   : > { %2992 = vrot.lane.b32.xlu0 %v2991_v12, %s3159_s9  ;;  %2323 = vmatpush3.bf16.xpose.msk.msra.mxu0 %vm3940_vm9, %v2321_v20  ;;  %v1557_v13 = vsel %vm1538_vm1, %v1524_v6, %v2559_v18  ;;  %v1558_v14 = vsel %vm1538_vm1, %v1525_v56, %v2560_v10  ;;  %v2710_v54 = vunpack.i.h.bf16 %v2708_v24  ;;  %v2709_v12 = vunpack.i.l.bf16 %v2708_v24  ;;  %v2163_v56 = vld [vmem:[%s3244_s30 + $0xd8] sm:$0xff] }
 0x102   : > { %v2718_v34 = vpop.permute.xlu1 %2717  ;;  %v1574_v48 = vsel %vm1571_vm2, %v1541_v44, %v2599_v57  ;;  %v1575_v49 = vsel %vm1571_vm2, %v1542_v45, %v2600_v37  ;;  %v1590_v5 = vsel %vm1571_vm2, %v1557_v13, %v2639_v17  ;;  %v1591_v16 = vsel %vm1571_vm2, %v1558_v14, %v2640_v42 }
 0x103   : > { %v2713_v15 = vpop.permute.xlu0 %2712  ;;  %v2720_v8 = vunpack.i.h.bf16 %v2718_v34  ;;  %v2719_v53 = vunpack.i.l.bf16 %v2718_v34  ;;  %v1623_v20 = vsel %vm1604_vm3, %v1590_v5, %v2699_v38  ;;  %v1624_v24 = vsel %vm1604_vm3, %v1591_v16, %v2700_v35 }
 0x104   : > { %3007 = vrot.lane.b32.xlu1 %v3980_v39, %s3161_s11  ;;  %v2705_v43 = vunpack.i.h.bf16 %v3972_v36  ;;  %v2704_v26 = vunpack.i.l.bf16 %v3972_v36  ;;  %v1656_v40 = vsel %vm1637_vm4, %v1623_v20, %v2709_v12  ;;  %v1657_v28 = vsel %vm1637_vm4, %v1624_v24, %v2710_v54  ;;  %v2179_v54 = vld [vmem:[%s3244_s30 + $0x198] sm:$0xff]  ;;  %v2196_v20 = vld [vmem:[%s3244_s30 + $0xe1] sm:$0xff] }
 0x105   : > { %3002 = vrot.lane.b32.xlu0 %v3001_v52, %s3160_s10  ;;  %v2715_v19 = vunpack.i.h.bf16 %v2713_v15  ;;  %v2714_v51 = vunpack.i.l.bf16 %v2713_v15  ;;  %v1689_v10 = vsel %vm1670_vm5, %v1656_v40, %v2719_v53  ;;  %v1690_v18 = vsel %vm1670_vm5, %v1657_v28, %v2720_v8  ;;  %v2164_v15 = vld [vmem:[%s3244_s30 + $0xe0] sm:$0xff] }
 0x106   : > { %v2728_v0 = vpop.permute.xlu1 %2727  ;;  %v1607_v35 = vsel %vm1604_vm3, %v1574_v48, %v2704_v26  ;;  %v1608_v38 = vsel %vm1604_vm3, %v1575_v49, %v2705_v43  ;;  %v3046_v53 = vpack.i.bf16 %v2164_v15, %v2163_v56  ;;  %v2445_v24 = vunpack.i.h.bf16 %v3540_v11  ;;  %v2211_v28 = vld [vmem:[%s3244_s30 + $0x199] sm:$0xff]  ;;  %v3072_v56 = vld [vmem:[%s3244_s30 + $0x30] sm:$0xff] }
 0x107   : > { %v2723_v50 = vpop.permute.xlu0 %2722  ;;  %v2730_v2 = vunpack.i.h.bf16 %v2728_v0  ;;  %v2729_v4 = vunpack.i.l.bf16 %v2728_v0  ;;  %v1640_v12 = vsel %vm1637_vm4, %v1607_v35, %v2714_v51  ;;  %v1641_v0 = vsel %vm1637_vm4, %v1608_v38, %v2715_v19  ;;  %v2212_v19 = vld [vmem:[%s3244_s30 + $0x1a1] sm:$0xff]  ;;  %v3073_v15 = vld [vmem:[%s3244_s30 + $0x38] sm:$0xff] }
 0x108   : > { %3017 = vrot.lane.b32.xlu1 %v3887_v29, %s3156_s6  ;;  %v2725_v57 = vunpack.i.h.bf16 %v2723_v50  ;;  %v2724_v6 = vunpack.i.l.bf16 %v2723_v50  ;;  %v2605_v35 = vunpack.i.h.bf16 %v3785_v63  ;;  %v2644_v38 = vunpack.i.l.bf16 %v3854_v1  ;;  %s4302_s6 = scalar_lea.hbm %s4352_s3, %s2283_s28 }
 0x109   : > { %3012 = vrot.lane.b32.xlu0 %v3989_v7, %s3161_s11  ;;  %v1722_v36 = vsel %vm1703_vm6, %v1689_v10, %v2729_v4  ;;  %v1723_v37 = vsel %vm1703_vm6, %v1690_v18, %v2730_v2  ;;  %v2195_v4 = vld [vmem:[%s3244_s30 + $0xd9] sm:$0xff]  ;;  %v2485_v10 = vunpack.i.h.bf16 %v3582_v33  ;;  %v2484_v18 = vunpack.i.l.bf16 %v3582_v33 }
 0x10a   : > { %v2738_v29 = vpop.permute.xlu1 %2737  ;;  %v1673_v50 = vsel %vm1670_vm5, %v1640_v12, %v2724_v6  ;;  %v3051_v6 = vpack.i.bf16 %v2212_v19, %v2211_v28  ;;  %v4368_v12 = vld [vmem:[#allocation5_spill] sm:$0xff] }
 0x10b   : > { %v2740_v34 = vunpack.i.h.bf16 %v2738_v29  ;;  %v2739_v46 = vunpack.i.l.bf16 %v2738_v29  ;;  %v2733_v9 = vpop.permute.xlu0 %2732  ;;  %v2227_v29 = vld [vmem:[%s3244_s30 + $0xda] sm:$0xff] }
 0x10c   : > { %3027 = vrot.lane.b32.xlu1 %v3001_v52, %s3157_s7  ;;  %v2735_v44 = vunpack.i.h.bf16 %v2733_v9  ;;  %v2734_v45 = vunpack.i.l.bf16 %v2733_v9  ;;  %v2180_v52 = vld [vmem:[%s3244_s30 + $0x1a0] sm:$0xff] }
 0x10d   : > { %v1755_v42 = vsel %vm1736_vm7, %v1722_v36, %v2739_v46  ;;  %v1756_v17 = vsel %vm1736_vm7, %v1723_v37, %v2740_v34  ;;  %3022 = vrot.lane.b32.xlu0 %v3952_v21, %s3157_s7  ;;  %v1674_v21 = vsel %vm1670_vm5, %v1641_v0, %v2725_v57  ;;  %v3041_v2 = vpack.i.bf16 %v2180_v52, %v2179_v54  ;;  %v2228_v34 = vld [vmem:[%s3244_s30 + $0xe2] sm:$0xff]  ;;  %v2243_v46 = vld [vmem:[%s3244_s30 + $0x19a] sm:$0xff]  ;;  %s1950_s7 = scalar_lea.sflag [#allocation3], %s175_s26 }
 0x10e   : > { %v2324_v13 = vpack.c.bf16 %v1756_v17, %v1755_v42  ;;  %v4039_v14 = vpop.permute.xlu1 %2747  ;;  %v1706_v5 = vsel %vm1703_vm6, %v1673_v50, %v2734_v45  ;;  %v1707_v16 = vsel %vm1703_vm6, %v1674_v21, %v2735_v44  ;;  %v2244_v9 = vld [vmem:[%s3244_s30 + $0x1a2] sm:$0xff]  ;;  %v2525_v36 = vunpack.i.h.bf16 %v3611_v22  ;;  %s1966_s30 = sshll.u32 %s177_s29, 4  ;;  %s4304_s30 = int_to_ptr.vmem [resolvable:$true] %s1966_s30 }
 0x10f   : > { %v2743_v8 = vpop.permute.xlu0 %2742  ;;  %v2524_v37 = vunpack.i.l.bf16 %v3611_v22  ;;  %v2564_v57 = vunpack.i.l.bf16 %v3702_v55  ;;  %v1511_v42 = vsel %vm1505_vm0, %v3073_v15, %v2445_v24  ;;  %v2565_v17 = vunpack.i.h.bf16 %v3702_v55  ;;  %v4089_v22 = vld [vmem:[%s4350_s1] sm:$0xff]  ;;  %v4369_v0 = vld [vmem:[#allocation6_spill] sm:$0xff]  ;;  %s3074_s15 = scalar_lea.vmem %s4304_s30, 256 }
 0x110   : > { %v2745_v48 = vunpack.i.h.bf16 %v2743_v8  ;;  %v2744_v49 = vunpack.i.l.bf16 %v2743_v8  ;;  %3037 = vrot.lane.b32.xlu1 %v3989_v7, %s3158_s8  ;;  %2326 = vmatprep.subr.msk.bf16.mxu0 %vm3940_vm9, %v2324_v13  ;;  %v2444_v7 = vunpack.i.l.bf16 %v3540_v11  ;;  %v3056_v11 = vpack.i.bf16 %v2196_v20, %v2195_v4  ;;  %p3075_p12 = scmp.ne.s32.totalorder %s4304_s30, %s3074_s15 }
 0x111   : > { %3032 = vrot.lane.b32.xlu0 %v3980_v39, %s3158_s8  ;;  %v2604_v44 = vunpack.i.l.bf16 %v3785_v63  ;;  %v3066_v54 = vpack.i.bf16 %v2228_v34, %v2227_v29  ;;  %v3061_v52 = vpack.i.bf16 %v2244_v9, %v2243_v46  ;;  %2316 = vmatprep.mubr.msk.f32.mxu0 %vm1776_vm8, %v4089_v22  ;;  %v1526_v55 = vsel %vm1505_vm0, %v4368_v12, %v2484_v18  ;;  %s3163_s8 = smov [#allocation2]  }
 0x112   : > { %v1739_v43 = vsel %vm1736_vm7, %v1706_v5, %v2744_v49  ;;  %v1740_v26 = vsel %vm1736_vm7, %v1707_v16, %v2745_v48  ;;  %v4061_v40 = vpop.permute.xlu1 %2757  ;;  %v1510_v33 = vsel %vm1505_vm0, %v3072_v56, %v2444_v7  ;;  %v1527_v8 = vsel %vm1505_vm0, %v4369_v0, %v2485_v10  ;;  %p3076_p13 = pnand %p3075_p12, %p3224_p4 }
 0x113   : > { %v2327_v51 = vpack.c.bf16 %v1740_v26, %v1739_v43  ;;  %v4065_v39 = vpop.permute.xlu0 %2752  ;;  %v2749_v50 = vunpack.i.l.bf16 %v4039_v14  ;;  %v1543_v63 = vsel %vm1538_vm1, %v1510_v33, %v2524_v37  ;;  %v1544_v21 = vsel %vm1538_vm1, %v1511_v42, %v2525_v36  ;;  %v1770_v37 = vld [vmem:[%s4351_s2] sm:$0xff] }
 0x114   : > { %3047 = vrot.lane.b32.xlu1 %v3046_v53, %s3159_s9  ;;  %v2645_v53 = vunpack.i.h.bf16 %v3854_v1  ;;  %v1559_v48 = vsel %vm1538_vm1, %v1526_v55, %v2564_v57  ;;  %v2750_v49 = vunpack.i.h.bf16 %v4039_v14  ;;  %v1560_v5 = vsel %vm1538_vm1, %v1527_v8, %v2565_v17  ;;  %p3077_p0 = pneg %p3076_p13 }
 0x115   : > { %3042 = vrot.lane.b32.xlu0 %v3041_v2, %s3159_s9  ;;  %2329 = vmatpush3.bf16.xpose.msk.msra.mxu0 %vm3940_vm9, %v2327_v51  ;;  %v1576_v16 = vsel %vm1571_vm2, %v1543_v63, %v2604_v44  ;;  %v2760_v1 = vunpack.i.h.bf16 %v4061_v40  ;;  %v2759_v2 = vunpack.i.l.bf16 %v4061_v40  ;;  %v1577_v20 = vsel %vm1571_vm2, %v1544_v21, %v2605_v35  ;;  %s3078_s9 = sshll.u32 %s3163_s8, 4  ;;  %s3079_s9 = int_to_ptr.vmem [resolvable:$false] %s3078_s9 }
 0x116   : > { %v2768_v45 = vpop.permute.xlu1 %2767  ;;  %v1592_v24 = vsel %vm1571_vm2, %v1559_v48, %v2644_v38  ;;  %v1593_v14 = vsel %vm1571_vm2, %v1560_v5, %v2645_v53  ;;  %v2755_v40 = vunpack.i.h.bf16 %v4065_v39  ;;  %v2754_v10 = vunpack.i.l.bf16 %v4065_v39  ;;  %p3081_p1 = scmp.lt.s32.totalorder %s4304_s30, %s3079_s9 }
 0x117   : > { %v2763_v13 = vpop.permute.xlu0 %2762  ;;  %v2770_v7 = vunpack.i.h.bf16 %v2768_v45  ;;  %v2769_v43 = vunpack.i.l.bf16 %v2768_v45  ;;  %v1625_v28 = vsel %vm1604_vm3, %v1592_v24, %v2749_v50  ;;  %v1626_v29 = vsel %vm1604_vm3, %v1593_v14, %v2750_v49 }
 0x118   : > { %3057 = vrot.lane.b32.xlu1 %v3056_v11, %s3160_s10  ;;  %v1658_v18 = vsel %vm1637_vm4, %v1625_v28, %v2759_v2  ;;  %v1659_v11 = vsel %vm1637_vm4, %v1626_v29, %v2760_v1  ;;  %v2765_v34 = vunpack.i.h.bf16 %v2763_v13  ;;  %v2764_v46 = vunpack.i.l.bf16 %v2763_v13 }
 0x119   : > { %3052 = vrot.lane.b32.xlu0 %v3051_v6, %s3160_s10  ;;  %v3162_v36 = vmov 0   ;;  %v1691_v57 = vsel %vm1670_vm5, %v1658_v18, %v2769_v43  ;;  %v1692_v6 = vsel %vm1670_vm5, %v1659_v11, %v2770_v7  ;;  %s3080_s10 = scalar_lea.vmem %s3079_s9, 512 }
 0x11a   : > { %v2778_v4 = vpop.permute.xlu1 %2777  ;;  %3071 = vset.pattern.permute.xlu0 %v3162_v36  ;;  %p3082_p2 = scmp.lt.s32.totalorder %s3080_s10, %s3074_s15 }
 0x11b   : > { %v2773_v26 = vpop.permute.xlu0 %2772  ;;  %v2780_v19 = vunpack.i.h.bf16 %v2778_v4  ;;  %v2779_v51 = vunpack.i.l.bf16 %v2778_v4 }
 0x11c   : > { %3067 = vrot.lane.b32.xlu1 %v3066_v54, %s3161_s11  ;;  %v2775_v17 = vunpack.i.h.bf16 %v2773_v26  ;;  %v2774_v44 = vunpack.i.l.bf16 %v2773_v26  ;;  %v1609_v54 = vsel %vm1604_vm3, %v1576_v16, %v2754_v10  ;;  %p3083_p3 = por %p3082_p2, %p3081_p1 }
 0x11d   : > { %3062 = vrot.lane.b32.xlu0 %v3061_v52, %s3161_s11  ;;  %v1724_v15 = vsel %vm1703_vm6, %v1691_v57, %v2779_v51  ;;  %v1725_v42 = vsel %vm1703_vm6, %v1692_v6, %v2780_v19  ;;  %v1610_v52 = vsel %vm1604_vm3, %v1577_v20, %v2755_v40  ;;  %v1642_v0 = vsel %vm1637_vm4, %v1609_v54, %v2764_v46 }
 0x11e   : > { %v2788_v9 = vpop.permute.xlu1 %2787  ;;  %v1643_v8 = vsel %vm1637_vm4, %v1610_v52, %v2765_v34  ;;  %v1675_v50 = vsel %vm1670_vm5, %v1642_v0, %v2774_v44  ;;  %p3084_p5 = pnand %p3083_p3, %p3077_p0 }
 0x11f   : > { %v2790_v39 = vunpack.i.h.bf16 %v2788_v9  ;;  %v2789_v56 = vunpack.i.l.bf16 %v2788_v9  ;;  %v2783_v33 = vpop.permute.xlu0 %2782  ;;  %v1676_v63 = vsel %vm1670_vm5, %v1643_v8, %v2775_v17 }
 0x120   : > { %v2785_v38 = vunpack.i.h.bf16 %v2783_v33  ;;  %v2784_v13 = vunpack.i.l.bf16 %v2783_v33 }
 0x121   : > { %v1757_v45 = vsel %vm1736_vm7, %v1724_v15, %v2789_v56  ;;  %v1758_v35 = vsel %vm1736_vm7, %v1725_v42, %v2790_v39  ;;  %1773 = vperm.xlu0 %3071, %v1770_v37  }
 0x122   : > { %v2330_v12 = vpack.c.bf16 %v1758_v35, %v1757_v45  ;;  %v2798_v55 = vpop.permute.xlu1 %2797  ;;  %v1708_v49 = vsel %vm1703_vm6, %v1675_v50, %v2784_v13  ;;  %v1709_v5 = vsel %vm1703_vm6, %v1676_v63, %v2785_v38 }
 0x123   : > { %v2793_v53 = vpop.permute.xlu0 %2792  ;;  %v2800_v43 = vunpack.i.h.bf16 %v2798_v55  ;;  %v2799_v26 = vunpack.i.l.bf16 %v2798_v55 }
 0x124   : > { %v2795_v21 = vunpack.i.h.bf16 %v2793_v53  ;;  %v2794_v48 = vunpack.i.l.bf16 %v2793_v53  ;;  %2332 = vmatprep.subr.msk.bf16.mxu0 %vm3940_vm9, %v2330_v12 }
 0x125   : > { %v1594_v10 = vsel %vm1571_vm2, %v3713_v59, %v2799_v26  ;;  %v1595_v18 = vsel %vm1571_vm2, %v3716_v23, %v2800_v43 }
 0x126   : > { %v1741_v16 = vsel %vm1736_vm7, %v1708_v49, %v2794_v48  ;;  %v1742_v1 = vsel %vm1736_vm7, %v1709_v5, %v2795_v21  ;;  %v2808_v2 = vpop.permute.xlu1 %2807 }
 0x127   : > { %v2333_v4 = vpack.c.bf16 %v1742_v1, %v1741_v16  ;;  %v2803_v20 = vpop.permute.xlu0 %2802  ;;  %v2810_v28 = vunpack.i.h.bf16 %v2808_v2  ;;  %v2809_v19 = vunpack.i.l.bf16 %v2808_v2 }
 0x128   : > { %v2805_v29 = vunpack.i.h.bf16 %v2803_v20  ;;  %v2804_v40 = vunpack.i.l.bf16 %v2803_v20 }
 0x129   : > { %2335 = vmatpush3.bf16.xpose.msk.msra.mxu0 %vm3940_vm9, %v2333_v4  ;;  %v1611_v6 = vsel %vm1604_vm3, %v3791_v47, %v2809_v19  ;;  %v1612_v39 = vsel %vm1604_vm3, %v3795_v62, %v2810_v28 }
 0x12a   : > { %v2818_v24 = vpop.permute.xlu1 %2817  ;;  %v1627_v59 = vsel %vm1604_vm3, %v1594_v10, %v2804_v40  ;;  %v1628_v23 = vsel %vm1604_vm3, %v1595_v18, %v2805_v29 }
 0x12b   : > { %v2813_v7 = vpop.permute.xlu0 %2812  ;;  %v2820_v11 = vunpack.i.h.bf16 %v2818_v24  ;;  %v2819_v34 = vunpack.i.l.bf16 %v2818_v24 }
 0x12c   : > { %v2815_v46 = vunpack.i.h.bf16 %v2813_v7  ;;  %v2814_v9 = vunpack.i.l.bf16 %v2813_v7 }
 0x12d   : > { %v1644_v44 = vsel %vm1637_vm4, %v1611_v6, %v2819_v34  ;;  %v1645_v45 = vsel %vm1637_vm4, %v1612_v39, %v2820_v11 }
 0x12e   : > { %v2828_v14 = vpop.permute.xlu1 %2827  ;;  %v1660_v47 = vsel %vm1637_vm4, %v1627_v59, %v2814_v9  ;;  %v1661_v13 = vsel %vm1637_vm4, %v1628_v23, %v2815_v46 }
 0x12f   : > { %v2823_v51 = vpop.permute.xlu0 %2822  ;;  %v2830_v36 = vunpack.i.h.bf16 %v2828_v14  ;;  %v2829_v37 = vunpack.i.l.bf16 %v2828_v14 }
 0x130   : > { %v2825_v56 = vunpack.i.h.bf16 %v2823_v51  ;;  %v2824_v33 = vunpack.i.l.bf16 %v2823_v51 }
 0x131   : > { %v1677_v62 = vsel %vm1670_vm5, %v1644_v44, %v2829_v37  ;;  %v1678_v54 = vsel %vm1670_vm5, %v1645_v45, %v2830_v36 }
 0x132   : > { %v2838_v57 = vpop.permute.xlu1 %2837  ;;  %v1693_v12 = vsel %vm1670_vm5, %v1660_v47, %v2824_v33  ;;  %v1694_v55 = vsel %vm1670_vm5, %v1661_v13, %v2825_v56 }
 0x133   : > { %v2833_v15 = vpop.permute.xlu0 %2832  ;;  %v2840_v42 = vunpack.i.h.bf16 %v2838_v57  ;;  %v2839_v17 = vunpack.i.l.bf16 %v2838_v57 }
 0x134   : > { %v2835_v35 = vunpack.i.h.bf16 %v2833_v15  ;;  %v2834_v38 = vunpack.i.l.bf16 %v2833_v15 }
 0x135   : > { %v1710_v50 = vsel %vm1703_vm6, %v1677_v62, %v2839_v17  ;;  %v1711_v63 = vsel %vm1703_vm6, %v1678_v54, %v2840_v42 }
 0x136   : > { %v2848_v52 = vpop.permute.xlu1 %2847  ;;  %v1726_v49 = vsel %vm1703_vm6, %v1693_v12, %v2834_v38  ;;  %v1727_v5 = vsel %vm1703_vm6, %v1694_v55, %v2835_v35 }
 0x137   : > { %v2850_v0 = vunpack.i.h.bf16 %v2848_v52  ;;  %v2849_v8 = vunpack.i.l.bf16 %v2848_v52  ;;  %v2843_v53 = vpop.permute.xlu0 %2842 }
 0x138   : > { %v2845_v21 = vunpack.i.h.bf16 %v2843_v53  ;;  %v2844_v48 = vunpack.i.l.bf16 %v2843_v53 }
 0x139   : > { %v1743_v16 = vsel %vm1736_vm7, %v1710_v50, %v2849_v8  ;;  %v1744_v1 = vsel %vm1736_vm7, %v1711_v63, %v2850_v0 }
 0x13a   : > { %v2339_v2 = vpack.c.bf16 %v1744_v1, %v1743_v16  ;;  %v1759_v4 = vsel %vm1736_vm7, %v1726_v49, %v2844_v48  ;;  %v1760_v20 = vsel %vm1736_vm7, %v1727_v5, %v2845_v21  ;;  %v2858_v24 = vpop.permute.xlu1 %2857 }
 0x13b   : > { %v2336_v7 = vpack.c.bf16 %v1760_v20, %v1759_v4  ;;  %v2853_v43 = vpop.permute.xlu0 %2852  ;;  %v2860_v40 = vunpack.i.h.bf16 %v2858_v24  ;;  %v2859_v10 = vunpack.i.l.bf16 %v2858_v24 }
 0x13c   : > { %v2855_v28 = vunpack.i.h.bf16 %v2853_v43  ;;  %v2854_v19 = vunpack.i.l.bf16 %v2853_v43 }
 0x13d   : > { %2338 = vmatprep.subr.msk.bf16.mxu0 %vm3940_vm9, %v2336_v7 }
 0x13e   : > { %2341 = vmatpush3.bf16.xpose.msk.msra.mxu0 %vm3940_vm9, %v2339_v2  ;;  %v2868_v26 = vpop.permute.xlu1 %2867  ;;  %v1596_v18 = vsel %vm1571_vm2, %v3747_v58, %v2854_v19  ;;  %v1597_v11 = vsel %vm1571_vm2, %v3750_v30, %v2855_v28 }
 0x13f   : > { %v2863_v14 = vpop.permute.xlu0 %2862  ;;  %v2870_v34 = vunpack.i.h.bf16 %v2868_v26  ;;  %v2869_v46 = vunpack.i.l.bf16 %v2868_v26  ;;  %v1629_v56 = vsel %vm1604_vm3, %v1596_v18, %v2859_v10  ;;  %v1630_v33 = vsel %vm1604_vm3, %v1597_v11, %v2860_v40 }
 0x140   : > { %v2865_v15 = vunpack.i.h.bf16 %v2863_v14  ;;  %v2864_v59 = vunpack.i.l.bf16 %v2863_v14 }
 0x141   : > { %v1662_v23 = vsel %vm1637_vm4, %v1629_v56, %v2869_v46  ;;  %v1663_v58 = vsel %vm1637_vm4, %v1630_v33, %v2870_v34 }
 0x142   : > { %v2878_v51 = vpop.permute.xlu1 %2877  ;;  %v1613_v53 = vsel %vm1604_vm3, %v3812_v60, %v2864_v59  ;;  %v1614_v50 = vsel %vm1604_vm3, %v3816_v32, %v2865_v15 }
 0x143   : > { %v2873_v29 = vpop.permute.xlu0 %2872  ;;  %v2880_v36 = vunpack.i.h.bf16 %v2878_v51  ;;  %v2879_v37 = vunpack.i.l.bf16 %v2878_v51 }
 0x144   : > { %v2875_v42 = vunpack.i.h.bf16 %v2873_v29  ;;  %v2874_v30 = vunpack.i.l.bf16 %v2873_v29 }
 0x145   : > { %v1695_v44 = vsel %vm1670_vm5, %v1662_v23, %v2879_v37  ;;  %v1696_v45 = vsel %vm1670_vm5, %v1663_v58, %v2880_v36 }
 0x146   : > { %v2888_v9 = vpop.permute.xlu1 %2887  ;;  %v1646_v48 = vsel %vm1637_vm4, %v1613_v53, %v2874_v30  ;;  %v1647_v49 = vsel %vm1637_vm4, %v1614_v50, %v2875_v42 }
 0x147   : > { %v2883_v57 = vpop.permute.xlu0 %2882  ;;  %v2890_v6 = vunpack.i.h.bf16 %v2888_v9  ;;  %v2889_v39 = vunpack.i.l.bf16 %v2888_v9 }
 0x148   : > { %v2885_v54 = vunpack.i.h.bf16 %v2883_v57  ;;  %v2884_v52 = vunpack.i.l.bf16 %v2883_v57 }
 0x149   : > { %v1728_v13 = vsel %vm1703_vm6, %v1695_v44, %v2889_v39  ;;  %v1729_v62 = vsel %vm1703_vm6, %v1696_v45, %v2890_v6 }
 0x14a   : > { %v2898_v17 = vpop.permute.xlu1 %2897  ;;  %v1679_v16 = vsel %vm1670_vm5, %v1646_v48, %v2884_v52  ;;  %v1680_v1 = vsel %vm1670_vm5, %v1647_v49, %v2885_v54 }
 0x14b   : > { %v2900_v35 = vunpack.i.h.bf16 %v2898_v17  ;;  %v2899_v38 = vunpack.i.l.bf16 %v2898_v17  ;;  %v2893_v47 = vpop.permute.xlu0 %2892 }
 0x14c   : > { %v2895_v0 = vunpack.i.h.bf16 %v2893_v47  ;;  %v2894_v8 = vunpack.i.l.bf16 %v2893_v47 }
 0x14d   : > { %v1761_v12 = vsel %vm1736_vm7, %v1728_v13, %v2899_v38  ;;  %v1762_v55 = vsel %vm1736_vm7, %v1729_v62, %v2900_v35 }
 0x14e   : > { %v2342_v63 = vpack.c.bf16 %v1762_v55, %v1761_v12  ;;  %v2908_v21 = vpop.permute.xlu1 %2907  ;;  %v1712_v60 = vsel %vm1703_vm6, %v1679_v16, %v2894_v8  ;;  %v1713_v32 = vsel %vm1703_vm6, %v1680_v1, %v2895_v0 }
 0x14f   : > { %v2903_v5 = vpop.permute.xlu0 %2902  ;;  %v2910_v19 = vunpack.i.h.bf16 %v2908_v21  ;;  %v2909_v51 = vunpack.i.l.bf16 %v2908_v21 }
 0x150   : > { %v2905_v2 = vunpack.i.h.bf16 %v2903_v5  ;;  %v2904_v4 = vunpack.i.l.bf16 %v2903_v5  ;;  %2344 = vmatprep.subr.msk.bf16.mxu0 %vm3940_vm9, %v2342_v63 }
 0x151   : > { %v1598_v46 = vsel %vm1571_vm2, %v3740_v31, %v2909_v51  ;;  %v1599_v9 = vsel %vm1571_vm2, %v3743_v61, %v2910_v19 }
 0x152   : > { %v1745_v20 = vsel %vm1736_vm7, %v1712_v60, %v2904_v4  ;;  %v1746_v24 = vsel %vm1736_vm7, %v1713_v32, %v2905_v2  ;;  %v2918_v7 = vpop.permute.xlu1 %2917 }
 0x153   : > { %v2345_v43 = vpack.c.bf16 %v1746_v24, %v1745_v20  ;;  %v2913_v26 = vpop.permute.xlu0 %2912  ;;  %v2920_v40 = vunpack.i.h.bf16 %v2918_v7  ;;  %v2919_v10 = vunpack.i.l.bf16 %v2918_v7 }
 0x154   : > { %v2915_v11 = vunpack.i.h.bf16 %v2913_v26  ;;  %v2914_v34 = vunpack.i.l.bf16 %v2913_v26 }
 0x155   : > { %2347 = vmatpush3.bf16.xpose.msk.msra.mxu0 %vm3940_vm9, %v2345_v43  ;;  %v1615_v15 = vsel %vm1604_vm3, %v3803_v41, %v2919_v10  ;;  %v1616_v59 = vsel %vm1604_vm3, %v3807_v3, %v2920_v40 }
 0x156   : > { %v2928_v14 = vpop.permute.xlu1 %2927  ;;  %v1631_v31 = vsel %vm1604_vm3, %v1598_v46, %v2914_v34  ;;  %v1632_v61 = vsel %vm1604_vm3, %v1599_v9, %v2915_v11 }
 0x157   : > { %v2923_v28 = vpop.permute.xlu0 %2922  ;;  %v2930_v36 = vunpack.i.h.bf16 %v2928_v14  ;;  %v2929_v37 = vunpack.i.l.bf16 %v2928_v14 }
 0x158   : > { %v2925_v57 = vunpack.i.h.bf16 %v2923_v28  ;;  %v2924_v6 = vunpack.i.l.bf16 %v2923_v28 }
 0x159   : > { %v1648_v44 = vsel %vm1637_vm4, %v1615_v15, %v2929_v37  ;;  %v1649_v45 = vsel %vm1637_vm4, %v1616_v59, %v2930_v36 }
 0x15a   : > { %v2938_v29 = vpop.permute.xlu1 %2937  ;;  %v1664_v41 = vsel %vm1637_vm4, %v1631_v31, %v2924_v6  ;;  %v1665_v47 = vsel %vm1637_vm4, %v1632_v61, %v2925_v57 }
 0x15b   : > { %v2933_v18 = vpop.permute.xlu0 %2932  ;;  %v2940_v39 = vunpack.i.h.bf16 %v2938_v29  ;;  %v2939_v56 = vunpack.i.l.bf16 %v2938_v29  ;;  %v4370_v29 = vld [vmem:[#allocation9_spill] sm:$0xff] }
 0x15c   : > { %v2935_v23 = vunpack.i.h.bf16 %v2933_v18  ;;  %v2934_v58 = vunpack.i.l.bf16 %v2933_v18 }
 0x15d   : > { %v1681_v3 = vsel %vm1670_vm5, %v1648_v44, %v2939_v56  ;;  %v1682_v13 = vsel %vm1670_vm5, %v1649_v45, %v2940_v39 }
 0x15e   : > { %v2948_v33 = vpop.permute.xlu1 %2947  ;;  %v1697_v54 = vsel %vm1670_vm5, %v1664_v41, %v2934_v58  ;;  %v1698_v52 = vsel %vm1670_vm5, %v1665_v47, %v2935_v23 }
 0x15f   : > { %v2943_v42 = vpop.permute.xlu0 %2942  ;;  %v2950_v30 = vunpack.i.h.bf16 %v2948_v33  ;;  %v2949_v17 = vunpack.i.l.bf16 %v2948_v33 }
 0x160   : > { %v2945_v35 = vunpack.i.h.bf16 %v2943_v42  ;;  %v2944_v38 = vunpack.i.l.bf16 %v2943_v42 }
 0x161   : > { %v1714_v8 = vsel %vm1703_vm6, %v1681_v3, %v2949_v17  ;;  %v1715_v53 = vsel %vm1703_vm6, %v1682_v13, %v2950_v30  ;;  %v4371_v13 = vld [vmem:[#allocation12_spill] sm:$0xff] }
 0x162   : > { %v2958_v62 = vpop.permute.xlu1 %2957  ;;  %v1730_v21 = vsel %vm1703_vm6, %v1697_v54, %v2944_v38  ;;  %v1731_v48 = vsel %vm1703_vm6, %v1698_v52, %v2945_v35  ;;  %v4372_v54 = vld [vmem:[#allocation13_spill] sm:$0xff] }
 0x163   : > { %v2960_v12 = vunpack.i.h.bf16 %v2958_v62  ;;  %v2959_v55 = vunpack.i.l.bf16 %v2958_v62  ;;  %v2953_v0 = vpop.permute.xlu0 %2952 }
 0x164   : > { %v2955_v50 = vunpack.i.h.bf16 %v2953_v0  ;;  %v2954_v63 = vunpack.i.l.bf16 %v2953_v0 }
 0x165   : > { %v1747_v49 = vsel %vm1736_vm7, %v1714_v8, %v2959_v55  ;;  %v1748_v5 = vsel %vm1736_vm7, %v1715_v53, %v2960_v12 }
 0x166   : > { %v2351_v16 = vpack.c.bf16 %v1748_v5, %v1747_v49  ;;  %v1763_v1 = vsel %vm1736_vm7, %v1730_v21, %v2954_v63  ;;  %v1764_v2 = vsel %vm1736_vm7, %v1731_v48, %v2955_v50  ;;  %v2968_v4 = vpop.permute.xlu1 %2967 }
 0x167   : > { %v2348_v60 = vpack.c.bf16 %v1764_v2, %v1763_v1  ;;  %v2963_v32 = vpop.permute.xlu0 %2962  ;;  %v2970_v28 = vunpack.i.h.bf16 %v2968_v4  ;;  %v2969_v19 = vunpack.i.l.bf16 %v2968_v4 }
 0x168   : > { %v2965_v7 = vunpack.i.h.bf16 %v2963_v32  ;;  %v2964_v43 = vunpack.i.l.bf16 %v2963_v32 }
 0x169   : > { %2350 = vmatprep.subr.msk.bf16.mxu0 %vm3940_vm9, %v2348_v60 }
 0x16a   : > { %2353 = vmatpush3.bf16.xpose.msk.msra.mxu0 %vm3940_vm9, %v2351_v16  ;;  %v2978_v20 = vpop.permute.xlu1 %2977  ;;  %v1600_v51 = vsel %vm1571_vm2, %v3768_v27, %v2964_v43  ;;  %v1601_v40 = vsel %vm1571_vm2, %v4370_v29, %v2965_v7  ;;  %v4373_v29 = vld [vmem:[#allocation7_spill] sm:$0xff] }
 0x16b   : > { %v2973_v24 = vpop.permute.xlu0 %2972  ;;  %v2980_v10 = vunpack.i.h.bf16 %v2978_v20  ;;  %v2979_v18 = vunpack.i.l.bf16 %v2978_v20  ;;  %v1633_v57 = vsel %vm1604_vm3, %v1600_v51, %v2969_v19  ;;  %v1634_v6 = vsel %vm1604_vm3, %v1601_v40, %v2970_v28 }
 0x16c   : > { %v2975_v39 = vunpack.i.h.bf16 %v2973_v24  ;;  %v2974_v56 = vunpack.i.l.bf16 %v2973_v24 }
 0x16d   : > { %v1666_v33 = vsel %vm1637_vm4, %v1633_v57, %v2979_v18  ;;  %v1667_v27 = vsel %vm1637_vm4, %v1634_v6, %v2980_v10  ;;  %v4374_v10 = vld [vmem:[#allocation8_spill] sm:$0xff]  ;;  %v4375_v6 = vld [vmem:[#allocation10_spill] sm:$0xff] }
 0x16e   : > { %v2988_v26 = vpop.permute.xlu1 %2987  ;;  %v1617_v62 = vsel %vm1604_vm3, %v4371_v13, %v2974_v56  ;;  %v1618_v52 = vsel %vm1604_vm3, %v4372_v54, %v2975_v39  ;;  %v4376_v56 = vld [vmem:[#allocation11_spill] sm:$0xff] }
 0x16f   : > { %v2983_v14 = vpop.permute.xlu0 %2982  ;;  %v2990_v34 = vunpack.i.h.bf16 %v2988_v26  ;;  %v2989_v46 = vunpack.i.l.bf16 %v2988_v26 }
 0x170   : > { %v2985_v15 = vunpack.i.h.bf16 %v2983_v14  ;;  %v2984_v59 = vunpack.i.l.bf16 %v2983_v14 }
 0x171   : > { %v1699_v58 = vsel %vm1670_vm5, %v1666_v33, %v2989_v46  ;;  %v1700_v42 = vsel %vm1670_vm5, %v1667_v27, %v2990_v34 }
 0x172   : > { %v2998_v11 = vpop.permute.xlu1 %2997  ;;  %v1650_v0 = vsel %vm1637_vm4, %v1617_v62, %v2984_v59  ;;  %v1651_v8 = vsel %vm1637_vm4, %v1618_v52, %v2985_v15 }
 0x173   : > { %v2993_v9 = vpop.permute.xlu0 %2992  ;;  %v3000_v36 = vunpack.i.h.bf16 %v2998_v11  ;;  %v2999_v37 = vunpack.i.l.bf16 %v2998_v11 }
 0x174   : > { %v2995_v45 = vunpack.i.h.bf16 %v2993_v9  ;;  %v2994_v35 = vunpack.i.l.bf16 %v2993_v9 }
 0x175   : > { %v1732_v17 = vsel %vm1703_vm6, %v1699_v58, %v2999_v37  ;;  %v1733_v44 = vsel %vm1703_vm6, %v1700_v42, %v3000_v36 }
 0x176   : > { %v3008_v23 = vpop.permute.xlu1 %3007  ;;  %v1683_v50 = vsel %vm1670_vm5, %v1650_v0, %v2994_v35  ;;  %v1684_v63 = vsel %vm1670_vm5, %v1651_v8, %v2995_v45 }
 0x177   : > { %v3010_v31 = vunpack.i.h.bf16 %v3008_v23  ;;  %v3009_v61 = vunpack.i.l.bf16 %v3008_v23  ;;  %v3003_v30 = vpop.permute.xlu0 %3002 }
 0x178   : > { %v3005_v47 = vunpack.i.h.bf16 %v3003_v30  ;;  %v3004_v3 = vunpack.i.l.bf16 %v3003_v30 }
 0x179   : > { %v1765_v38 = vsel %vm1736_vm7, %v1732_v17, %v3009_v61  ;;  %v1766_v41 = vsel %vm1736_vm7, %v1733_v44, %v3010_v31 }
 0x17a   : > { %v2354_v12 = vpack.c.bf16 %v1766_v41, %v1765_v38  ;;  %v3018_v55 = vpop.permute.xlu1 %3017  ;;  %v1716_v49 = vsel %vm1703_vm6, %v1683_v50, %v3004_v3  ;;  %v1717_v5 = vsel %vm1703_vm6, %v1684_v63, %v3005_v47 }
 0x17b   : > { %v3013_v53 = vpop.permute.xlu0 %3012  ;;  %v3020_v24 = vunpack.i.h.bf16 %v3018_v55  ;;  %v3019_v7 = vunpack.i.l.bf16 %v3018_v55 }
 0x17c   : > { %v3015_v21 = vunpack.i.h.bf16 %v3013_v53  ;;  %v3014_v48 = vunpack.i.l.bf16 %v3013_v53  ;;  %2356 = vmatprep.subr.msk.bf16.mxu0 %vm3940_vm9, %v2354_v12 }
 0x17d   : > { %v1602_v40 = vsel %vm1571_vm2, %v4373_v29, %v3019_v7  ;;  %v1603_v18 = vsel %vm1571_vm2, %v4374_v10, %v3020_v24 }
 0x17e   : > { %v1749_v16 = vsel %vm1736_vm7, %v1716_v49, %v3014_v48  ;;  %v1750_v1 = vsel %vm1736_vm7, %v1717_v5, %v3015_v21  ;;  %v3028_v2 = vpop.permute.xlu1 %3027 }
 0x17f   : > { %v2357_v4 = vpack.c.bf16 %v1750_v1, %v1749_v16  ;;  %v3023_v60 = vpop.permute.xlu0 %3022  ;;  %v3030_v26 = vunpack.i.h.bf16 %v3028_v2  ;;  %v3029_v14 = vunpack.i.l.bf16 %v3028_v2 }
 0x180   : > { %v3025_v19 = vunpack.i.h.bf16 %v3023_v60  ;;  %v3024_v51 = vunpack.i.l.bf16 %v3023_v60 }
 0x181   : > { %2359 = vmatpush3.bf16.xpose.msk.msra.mxu0 %vm3940_vm9, %v2357_v4  ;;  %v1619_v39 = vsel %vm1604_vm3, %v4375_v6, %v3029_v14  ;;  %v1620_v33 = vsel %vm1604_vm3, %v4376_v56, %v3030_v26 }
 0x182   : > { %v3038_v32 = vpop.permute.xlu1 %3037  ;;  %v1635_v23 = vsel %vm1604_vm3, %v1602_v40, %v3024_v51  ;;  %v1636_v58 = vsel %vm1604_vm3, %v1603_v18, %v3025_v19 }
 0x183   : > { %v3033_v20 = vpop.permute.xlu0 %3032  ;;  %v3040_v11 = vunpack.i.h.bf16 %v3038_v32  ;;  %v3039_v34 = vunpack.i.l.bf16 %v3038_v32 }
 0x184   : > { %v3035_v46 = vunpack.i.h.bf16 %v3033_v20  ;;  %v3034_v9 = vunpack.i.l.bf16 %v3033_v20 }
 0x185   : > { %v1652_v61 = vsel %vm1637_vm4, %v1619_v39, %v3039_v34  ;;  %v1653_v30 = vsel %vm1637_vm4, %v1620_v33, %v3040_v11 }
 0x186   : > { %v3048_v43 = vpop.permute.xlu1 %3047  ;;  %v1668_v45 = vsel %vm1637_vm4, %v1635_v23, %v3034_v9  ;;  %v1669_v35 = vsel %vm1637_vm4, %v1636_v58, %v3035_v46 }
 0x187   : > { %v3043_v28 = vpop.permute.xlu0 %3042  ;;  %v3050_v36 = vunpack.i.h.bf16 %v3048_v43  ;;  %v3049_v37 = vunpack.i.l.bf16 %v3048_v43 }
 0x188   : > { %v3045_v27 = vunpack.i.h.bf16 %v3043_v28  ;;  %v3044_v15 = vunpack.i.l.bf16 %v3043_v28 }
 0x189   : > { %v1685_v38 = vsel %vm1670_vm5, %v1652_v61, %v3049_v37  ;;  %v1686_v41 = vsel %vm1670_vm5, %v1653_v30, %v3050_v36 }
 0x18a   : > { %v3058_v57 = vpop.permute.xlu1 %3057  ;;  %v1701_v3 = vsel %vm1670_vm5, %v1668_v45, %v3044_v15  ;;  %v1702_v13 = vsel %vm1670_vm5, %v1669_v35, %v3045_v27 }
 0x18b   : > { %v3053_v59 = vpop.permute.xlu0 %3052  ;;  %v3060_v42 = vunpack.i.h.bf16 %v3058_v57  ;;  %v3059_v31 = vunpack.i.l.bf16 %v3058_v57 }
 0x18c   : > { %v3055_v17 = vunpack.i.h.bf16 %v3053_v59  ;;  %v3054_v44 = vunpack.i.l.bf16 %v3053_v59 }
 0x18d   : > { %v1718_v12 = vsel %vm1703_vm6, %v1685_v38, %v3059_v31  ;;  %v1719_v55 = vsel %vm1703_vm6, %v1686_v41, %v3060_v42 }
 0x18e   : > { %v3068_v47 = vpop.permute.xlu1 %3067  ;;  %v1734_v53 = vsel %vm1703_vm6, %v1701_v3, %v3054_v44  ;;  %v1735_v50 = vsel %vm1703_vm6, %v1702_v13, %v3055_v17 }
 0x18f   : > { %v3070_v62 = vunpack.i.h.bf16 %v3068_v47  ;;  %v3069_v54 = vunpack.i.l.bf16 %v3068_v47  ;;  %v3063_v52 = vpop.permute.xlu0 %3062 }
 0x190   : > { %v3065_v0 = vunpack.i.h.bf16 %v3063_v52  ;;  %v3064_v8 = vunpack.i.l.bf16 %v3063_v52 }
 0x191   : > { %v1751_v63 = vsel %vm1736_vm7, %v1718_v12, %v3069_v54  ;;  %v1752_v21 = vsel %vm1736_vm7, %v1719_v55, %v3070_v62 }
 0x192   : > { %v2363_v48 = vpack.c.bf16 %v1752_v21, %v1751_v63  ;;  %v1767_v49 = vsel %vm1736_vm7, %v1734_v53, %v3064_v8  ;;  %v1768_v5 = vsel %vm1736_vm7, %v1735_v50, %v3065_v0 }
 0x193   : > { %v2360_v16 = vpack.c.bf16 %v1768_v5, %v1767_v49 }
 0x195   : > { %2362 = vmatprep.subr.msk.bf16.mxu0 %vm3940_vm9, %v2360_v16 }
 0x196   : > { %2365 = vmatpush3.bf16.xpose.msk.msra.mxu0 %vm3940_vm9, %v2363_v48 }
 0x19d   : > { %2317 = vmatmul.mubr.msk.f32.vlgmr.msra.gmra.mrb[0].mxu0 %vm1776_vm8, %v4089_v22 }
 0x1a0   : > { %v1774_v1 = vpop.permute.xlu0 %1773 }
 0x270   : > { %v1942_v2 = vpop.f32.mrb[0].mxu0 }
 0x271   : > { %v1943_v4 = vadd.f32 %v1942_v2, %v1774_v1  ;;  %v1944_v60 = vpop.f32.mrb[1].mxu0 }
 0x272   : > { %v1945_v32 = vadd.f32 %v1944_v60, %v1774_v1 }
 0x273   : > { %1947 = vst [vmem:[%s177_s29] sm:$0xff] %v1943_v4 }
 0x274   : > { %1948 = vst [vmem:[%s177_s29 + $0x8] sm:$0xff] %v1945_v32 }
 0x275   : > { %3087 = shalt.err (!%p3084_p5)
}
 0x276   : > { %s3088_s11 = scalar_lea.hbm %s4302_s6, 256  ;;  %s3092_s21 = scalar_lea.hbm %s4352_s3, 512 }
 0x277   : > { %p3089_p6 = scmp.ne.s32.totalorder %s4302_s6, %s3088_s11  ;;  %p3093_p10 = scmp.lt.u32.totalorder %s4302_s6, %s4352_s3 }
 0x278   : > { %p3094_p11 = scmp.lt.u32.totalorder %s3092_s21, %s3088_s11  ;;  %p3096_p13 = scmp.lt.u32.totalorder %s3088_s11, %s4302_s6 }
 0x279   : > { %p3090_p7 = pnand %p3089_p6, %p3224_p4 }
 0x27a   : > { %p3095_p12 = por %p3094_p11, %p3093_p10 }
 0x27b   : > { %p3091_p9 = pneg %p3090_p7 }
 0x27c   : > { %p3097_p0 = por %p3096_p13, %p3095_p12 }
 0x27e   : > { %p3098_p1 = pnand %p3097_p0, %p3091_p9 }
 0x280   : > { %3101 = shalt.err (!%p3098_p1)
}
 0x281   : > { %2367 = dma.vmem_to_hbm [thread:$0]  (%p3224_p4), %s4304_s30, 256, %s4302_s6, %s1950_s7  }
 0x282 PF: > { %p2373_p2 = scmp.ge.s32.totalorder %s3152_s17, 2  ;;  %s1978_s27 = sand.u32 1, %s3132_s12  }
 0x283   : > { %s1979_s28 = scalar_lea.sflag [#allocation3], %s1978_s27 }
 0x284   : > { %p2370_p3 = pnand %p2373_p2, %p3231_p8 }
 0x286   : > { %3127 = dma.done.wait (!%p2370_p3), %s1979_s28, 256  }
 0x287   : > { %3129 = vsyncadd (!%p2370_p3), %s1979_s28, 4294967040  ;;  %s16_s17 = sadd.s32 1, %s3152_s17   ;;  %s4377_s12 = smov %s3136_s13 }
 0x288   : > { %p13_p5 = scmp.ge.s32.totalorder %s16_s17, 4   ;;  %s4378_s13 = smov %s3140_s14 }
 0x289   : > { %s4379_s14 = smov %s3237_s25  ;;  %s4380_s15 = smov %s3148_s16 }
 0x28a   : > { %s4381_s16 = smov %s4383_s20  ;;  %15 = sbr.rel (!%p13_p5) target bundleno = 4 (0x4), region = 70 }
 0x291   :  { %1984 = vsyncpa [#allocation3], 1 }
 0x292   :  { %1986 = vsyncpa [#allocation3 + $0x1], 1 }

</bundles_post_ra>
